<compile_context>
chip_gen: v6e
topology: v6e:2x2x1
jax: 0.10.0
libtpu: 0.0.40
codegen_flags: <defaults>
</compile_context>

<pallas_src>
import jax
import jax.numpy as jnp
from jax.experimental import pallas as pl
from jax.experimental.pallas import tpu as pltpu


def seq2seq_attn_kernel(
    # hoisted, h-independent activations
    enc_gi_ref,      # (T_in, B, 3H)  = enc_emb[x] @ W_ihT + b_ih
    dec_xc_ref,      # (T_out, B, H)  = dec_emb[y] @ comb_W[:H] + comb_b
    # encoder recurrent params
    enc_whhT_ref, enc_bhh_ref,
    # decoder params
    comb_wh_ref,                                   # comb_W[H:] (H, H)
    dec_wihT_ref, dec_bih_ref, dec_whhT_ref, dec_bhh_ref,
    out_wT_ref, out_b_ref,                         # padded to Vp lanes
    # outputs
    out_lp_ref,      # (T_out*B, Vp)  log-softmax of decoder logits (lane-dense)
    attn_ref,        # (B, T_out*T_in, H)  attention weights (identically 1.0)
):
    T_in, B, H3 = enc_gi_ref.shape
    H = H3 // 3
    T_out = dec_xc_ref.shape[0]
    f32 = jnp.float32

    def gru_gates(gi, gh, h):
        """PyTorch nn.GRU gate math, gate order [r, z, n]."""
        r = jax.nn.sigmoid(gi[:, 0:H] + gh[:, 0:H])
        z = jax.nn.sigmoid(gi[:, H:2 * H] + gh[:, H:2 * H])
        n = jnp.tanh(gi[:, 2 * H:3 * H] + r * gh[:, 2 * H:3 * H])
        return (1.0 - z) * n + z * h

    # ---------------- encoder: recurrence only (gi precomputed), static unroll --
    enc_whhT = enc_whhT_ref[...]
    enc_bhh = enc_bhh_ref[...]
    h = jnp.zeros((B, H), f32)
    enc_sum = jnp.zeros((B, H), f32)
    for t in range(T_in):                                      # T_in small & fixed
        gh = jnp.dot(h, enc_whhT, preferred_element_type=f32) + enc_bhh
        h = gru_gates(enc_gi_ref[t], gh, h)
        enc_sum = enc_sum + h                                  # context = sum of enc states

    # ---------------- decoder -------------------------------------------------
    # Attention weights are softmax over a size-1 axis == 1 exactly, so the
    # context vector enc_sum is h-independent; the whole attn_combine + input
    # gate chain is hoisted out of the recurrence.
    enc_part = jnp.dot(enc_sum, comb_wh_ref[...], preferred_element_type=f32)   # (B, H)

    dec_wihT = dec_wihT_ref[...]
    dec_bih = dec_bih_ref[...]
    dec_gis = []
    for t in range(T_out):                                     # h-independent, off critical path
        comb = jnp.maximum(dec_xc_ref[t] + enc_part, 0.0)      # ReLU(attn_combine(...))
        dec_gis.append(jnp.dot(comb, dec_wihT, preferred_element_type=f32) + dec_bih)

    # recurrence: only gh matmul + gate math per step, statically unrolled.
    # TODO(synk): the reference flips a np.random coin per step (teacher forcing)
    # and applies train-mode dropout; here we deterministically always teacher-
    # force and run dropout as identity (eval behaviour).
    dec_whhT = dec_whhT_ref[...]
    dec_bhh = dec_bhh_ref[...]
    hs = []
    for t in range(T_out):
        gh = jnp.dot(h, dec_whhT, preferred_element_type=f32) + dec_bhh
        h = gru_gates(dec_gis[t], gh, h)
        hs.append(h)

    # batched output projection + log-softmax, single lane-dense store.
    h_all = jnp.concatenate(hs, axis=0)                        # (T_out*B, H)
    logits = jnp.dot(h_all, out_wT_ref[...], preferred_element_type=f32) + out_b_ref[...]
    lmax = jnp.max(logits, axis=-1, keepdims=True)
    lse = lmax + jnp.log(jnp.sum(jnp.exp(logits - lmax), axis=-1, keepdims=True))
    out_lp_ref[...] = logits - lse                             # padded lanes sliced off outside

    # attention weights are provably all ones -> one bulk fill, no per-step stores.
    attn_ref[...] = jnp.ones_like(attn_ref)


PARAM_ORDER = ("enc_emb", "enc_wihT", "enc_whhT", "enc_bih", "enc_bhh",
               "dec_emb", "attn_fc2_wT", "attn_fc1_wT", "attn_fc_w", "attn_fc_b",
               "attn_comb_wT", "attn_comb_b",
               "dec_wihT", "dec_whhT", "dec_bih", "dec_bhh",
               "out_wT", "out_b")


def init_params(key, V_in, V_out, H):
    ks = jax.random.split(key, len(PARAM_ORDER))
    shapes = dict(
        enc_emb=(V_in, H),
        enc_wihT=(H, 3 * H), enc_whhT=(H, 3 * H),
        enc_bih=(1, 3 * H), enc_bhh=(1, 3 * H),
        dec_emb=(V_out, H),
        attn_fc2_wT=(H, H),
        attn_fc1_wT=(2 * H, H),
        attn_fc_w=(1, H), attn_fc_b=(1, 1),
        attn_comb_wT=(2 * H, H), attn_comb_b=(1, H),
        dec_wihT=(H, 3 * H), dec_whhT=(H, 3 * H),
        dec_bih=(1, 3 * H), dec_bhh=(1, 3 * H),
        out_wT=(H, V_out), out_b=(1, V_out),
    )
    return {name: 0.1 * jax.random.normal(k, shapes[name], jnp.float32)
            for name, k in zip(PARAM_ORDER, ks)}


def _round_up(x, m):
    return ((x + m - 1) // m) * m


@jax.jit
def seq2seq_attn_forward(params, x_tokens, y_tokens):
    B, T_in = x_tokens.shape
    _, T_out = y_tokens.shape
    H = params["enc_emb"].shape[1]
    V_out = params["out_wT"].shape[1]
    Vp = _round_up(V_out, 128)                     # lane-dense output projection

    # Embedding gathers + batched h-independent input projections (one big MXU /
    # XLA matmul each instead of per-step tiny ones inside the kernel).
    enc_x = jnp.transpose(params["enc_emb"][x_tokens], (1, 0, 2))          # (T_in, B, H)
    enc_gi = enc_x @ params["enc_wihT"] + params["enc_bih"]                # (T_in, B, 3H)
    dec_x = jnp.transpose(params["dec_emb"][y_tokens], (1, 0, 2))          # (T_out, B, H)
    dec_xc = dec_x @ params["attn_comb_wT"][:H] + params["attn_comb_b"]    # (T_out, B, H)

    # Pad the output projection to 128 lanes; padded columns get a huge negative
    # bias so they vanish under log-softmax and are sliced off afterwards.
    out_wT_pad = jnp.zeros((H, Vp), jnp.float32).at[:, :V_out].set(params["out_wT"])
    out_b_pad = jnp.full((1, Vp), -1e30, jnp.float32).at[:, :V_out].set(params["out_b"])

    vmem = pl.BlockSpec(memory_space=pltpu.MemorySpace.VMEM)

    cost = pl.CostEstimate(
        flops=(2 * B * H * 3 * H * (T_in + 2 * T_out)     # recurrent + dec input-gate matmuls
               + 2 * B * H * H                            # enc_sum @ comb_wh
               + 2 * T_out * B * H * Vp),                 # output projection
        transcendentals=(T_in + T_out) * B * 3 * H + T_out * B * Vp,
        bytes_accessed=4 * (T_in * B * 3 * H + T_out * B * H
                            + 3 * (H * 3 * H) + H * H + H * Vp
                            + T_out * B * Vp + B * T_out * T_in * H),
    )

    out_lp, attn = pl.pallas_call(
        seq2seq_attn_kernel,
        out_shape=(jax.ShapeDtypeStruct((T_out * B, Vp), jnp.float32),
                   jax.ShapeDtypeStruct((B, T_out * T_in, H), jnp.float32)),
        in_specs=[vmem] * 11,
        out_specs=(vmem, vmem),
        cost_estimate=cost,
    )(enc_gi, dec_xc,
      params["enc_whhT"], params["enc_bhh"],
      params["attn_comb_wT"][H:],
      params["dec_wihT"], params["dec_bih"], params["dec_whhT"], params["dec_bhh"],
      out_wT_pad, out_b_pad)

    # Back to PyTorch conventions.
    out = jnp.transpose(out_lp.reshape(T_out, B, Vp)[:, :, :V_out], (1, 2, 0))  # (B, V_out, T_out)
    return out, attn                                                            # (B, T_out*T_in, H)


# ---------------------------------------------------------------------------
# Pure-JAX reference (full model math, including the "dead" attention branch)
# ---------------------------------------------------------------------------
def _gru_ref(x, h, wihT, whhT, bih, bhh, H):
    gi = x @ wihT + bih
    gh = h @ whhT + bhh
    r = jax.nn.sigmoid(gi[:, :H] + gh[:, :H])
    z = jax.nn.sigmoid(gi[:, H:2 * H] + gh[:, H:2 * H])
    n = jnp.tanh(gi[:, 2 * H:] + r * gh[:, 2 * H:])
    return (1 - z) * n + z * h


def reference_forward(p, x_tok, y_tok):
    """Replica of Seq2SeqAttnNet.forward (always teacher-forced, no dropout)."""
    B, T_in = x_tok.shape
    _, T_out = y_tok.shape
    H = p["enc_emb"].shape[1]
    h = jnp.zeros((B, H), jnp.float32)
    enc_outs = []
    for t in range(T_in):
        x = p["enc_emb"][x_tok[:, t]]
        h = _gru_ref(x, h, p["enc_wihT"], p["enc_whhT"], p["enc_bih"], p["enc_bhh"], H)
        enc_outs.append(h)
    enc_out = jnp.stack(enc_outs, axis=1)                       # (B, T_in, H)
    wenc = enc_out @ p["attn_fc2_wT"]                           # (B, T_in, H)
    dec_h = h
    outs, attns = [], []
    for t in range(T_out):
        x = p["dec_emb"][y_tok[:, t]]                           # (B, H)
        wh = jnp.concatenate([x, dec_h], axis=1) @ p["attn_fc1_wT"]
        scores = jnp.sum((wh[:, None, :] + wenc) * p["attn_fc_w"][0], axis=-1,
                         keepdims=True) + p["attn_fc_b"][0, 0]  # (B, T_in, 1)
        attn_wts = jax.nn.softmax(scores, axis=2)               # size-1 axis -> all ones
        attn_full = jnp.broadcast_to(attn_wts, (B, T_in, H))
        attn_x = jnp.sum(enc_out * attn_full, axis=1)           # (B, H)
        comb = jnp.maximum(jnp.concatenate([x, attn_x], axis=1) @ p["attn_comb_wT"]
                           + p["attn_comb_b"], 0.0)
        dec_h = _gru_ref(comb, dec_h, p["dec_wihT"], p["dec_whhT"],
                         p["dec_bih"], p["dec_bhh"], H)
        logits = dec_h @ p["out_wT"] + p["out_b"]
        outs.append(jax.nn.log_softmax(logits, axis=-1))
        attns.append(attn_full)
    out = jnp.stack(outs, axis=2)                               # (B, V_out, T_out)
    attn = jnp.concatenate(attns, axis=1)                       # (B, T_out*T_in, H)
    return out, attn


if __name__ == "__main__":
    # Small shapes consistent with the module: vocab 16, hidden 32, seq lengths 8.
    B, T_in, T_out = 2, 8, 8
    V_in, V_out, H = 16, 16, 32

    root = jax.random.PRNGKey(0)
    kp, kx, ky = jax.random.split(root, 3)
    params = init_params(kp, V_in, V_out, H)
    x_tokens = jax.random.randint(kx, (B, T_in), 0, V_in, dtype=jnp.int32)    # encoder input
    y_tokens = jax.random.randint(ky, (B, T_out), 0, V_out, dtype=jnp.int32)  # decoder_inp

    out, attn = seq2seq_attn_forward(params, x_tokens, y_tokens)
    jax.block_until_ready((out, attn))

    out_exp, attn_exp = reference_forward(params, x_tokens, y_tokens)
    assert out.shape == (B, V_out, T_out)
    assert attn.shape == (B, T_out * T_in, H)
    assert bool(jnp.allclose(out, out_exp, atol=2e-3, rtol=2e-3))
    assert bool(jnp.allclose(attn, attn_exp, atol=1e-5))
    print("KERNEL_OK")
</pallas_src>

<mosaic_0001>
module attributes {stable_mosaic.version = 11 : i64} {
  func.func @seq2seq_attn_kernel(%arg0: memref<8x2x96xf32, #tpu.memory_space<vmem>>, %arg1: memref<8x2x32xf32, #tpu.memory_space<vmem>>, %arg2: memref<32x96xf32, #tpu.memory_space<vmem>>, %arg3: memref<1x96xf32, #tpu.memory_space<vmem>>, %arg4: memref<32x32xf32, #tpu.memory_space<vmem>>, %arg5: memref<32x96xf32, #tpu.memory_space<vmem>>, %arg6: memref<1x96xf32, #tpu.memory_space<vmem>>, %arg7: memref<32x96xf32, #tpu.memory_space<vmem>>, %arg8: memref<1x96xf32, #tpu.memory_space<vmem>>, %arg9: memref<32x128xf32, #tpu.memory_space<vmem>>, %arg10: memref<1x128xf32, #tpu.memory_space<vmem>>, %arg11: memref<16x128xf32, #tpu.memory_space<vmem>>, %arg12: memref<2x64x32xf32, #tpu.memory_space<vmem>>) attributes {dimension_semantics = [], scalar_prefetch = 0 : i64, scratch_operands = 0 : i64, tpu.core_type = #tpu.core_type<tc>} {
    %c0 = arith.constant 0 : index
    %c0_0 = arith.constant 0 : index
    %0 = vector.load %arg2[%c0, %c0_0] : memref<32x96xf32, #tpu.memory_space<vmem>>, vector<32x96xf32>
    %c0_1 = arith.constant 0 : index
    %c0_2 = arith.constant 0 : index
    %1 = vector.load %arg3[%c0_1, %c0_2] : memref<1x96xf32, #tpu.memory_space<vmem>>, vector<1x96xf32>
    %cst = arith.constant 0.000000e+00 : f32
    %2 = vector.broadcast %cst : f32 to vector<2x32xf32>
    %cst_3 = arith.constant 0.000000e+00 : f32
    %3 = vector.broadcast %cst_3 : f32 to vector<2x32xf32>
    %cst_4 = arith.constant dense<0.000000e+00> : vector<2x96xf32>
    %4 = tpu.matmul %2, %0, %cst_4 {dimension_numbers = #tpu.dot_dimension_numbers<[1], [0], [0], [1], [0, 0, 1, 1], [], []>} : vector<2x32xf32>, vector<32x96xf32>, vector<2x96xf32> -> vector<2x96xf32>
    %5 = vector.broadcast %1 : vector<1x96xf32> to vector<2x96xf32>
    %6 = arith.addf %4, %5 : vector<2x96xf32>
    %c0_5 = arith.constant 0 : index
    %c0_6 = arith.constant 0 : index
    %c0_7 = arith.constant 0 : index
    %7 = vector.load %arg0[%c0_5, %c0_6, %c0_7] : memref<8x2x96xf32, #tpu.memory_space<vmem>>, vector<1x2x96xf32>
    %8 = vector.shape_cast %7 : vector<1x2x96xf32> to vector<2x96xf32>
    %9 = vector.extract_strided_slice %8 {offsets = [0, 0], sizes = [2, 32], strides = [1, 1]} : vector<2x96xf32> to vector<2x32xf32>
    %10 = vector.extract_strided_slice %6 {offsets = [0, 0], sizes = [2, 32], strides = [1, 1]} : vector<2x96xf32> to vector<2x32xf32>
    %11 = arith.addf %9, %10 : vector<2x32xf32>
    %12 = arith.negf %11 : vector<2x32xf32>
    %13 = math.exp %12 : vector<2x32xf32>
    %cst_8 = arith.constant 1.000000e+00 : f32
    %14 = vector.broadcast %cst_8 : f32 to vector<2x32xf32>
    %15 = arith.addf %14, %13 : vector<2x32xf32>
    %16 = arith.divf %14, %15 : vector<2x32xf32>
    %17 = vector.extract_strided_slice %8 {offsets = [0, 32], sizes = [2, 32], strides = [1, 1]} : vector<2x96xf32> to vector<2x32xf32>
    %18 = vector.extract_strided_slice %6 {offsets = [0, 32], sizes = [2, 32], strides = [1, 1]} : vector<2x96xf32> to vector<2x32xf32>
    %19 = arith.addf %17, %18 : vector<2x32xf32>
    %20 = arith.negf %19 : vector<2x32xf32>
    %21 = math.exp %20 : vector<2x32xf32>
    %cst_9 = arith.constant 1.000000e+00 : f32
    %22 = vector.broadcast %cst_9 : f32 to vector<2x32xf32>
    %23 = arith.addf %22, %21 : vector<2x32xf32>
    %24 = arith.divf %22, %23 : vector<2x32xf32>
    %25 = vector.extract_strided_slice %8 {offsets = [0, 64], sizes = [2, 32], strides = [1, 1]} : vector<2x96xf32> to vector<2x32xf32>
    %26 = vector.extract_strided_slice %6 {offsets = [0, 64], sizes = [2, 32], strides = [1, 1]} : vector<2x96xf32> to vector<2x32xf32>
    %27 = arith.mulf %16, %26 : vector<2x32xf32>
    %28 = arith.addf %25, %27 : vector<2x32xf32>
    %29 = math.tanh %28 : vector<2x32xf32>
    %cst_10 = arith.constant 1.000000e+00 : f32
    %30 = vector.broadcast %cst_10 : f32 to vector<2x32xf32>
    %31 = arith.subf %30, %24 : vector<2x32xf32>
    %32 = arith.mulf %31, %29 : vector<2x32xf32>
    %33 = arith.mulf %24, %2 : vector<2x32xf32>
    %34 = arith.addf %32, %33 : vector<2x32xf32>
    %35 = arith.addf %3, %34 : vector<2x32xf32>
    %cst_11 = arith.constant dense<0.000000e+00> : vector<2x96xf32>
    %36 = tpu.matmul %34, %0, %cst_11 {dimension_numbers = #tpu.dot_dimension_numbers<[1], [0], [0], [1], [0, 0, 1, 1], [], []>} : vector<2x32xf32>, vector<32x96xf32>, vector<2x96xf32> -> vector<2x96xf32>
    %37 = vector.broadcast %1 : vector<1x96xf32> to vector<2x96xf32>
    %38 = arith.addf %36, %37 : vector<2x96xf32>
    %c1 = arith.constant 1 : index
    %c0_12 = arith.constant 0 : index
    %c0_13 = arith.constant 0 : index
    %39 = vector.load %arg0[%c1, %c0_12, %c0_13] : memref<8x2x96xf32, #tpu.memory_space<vmem>>, vector<1x2x96xf32>
    %40 = vector.shape_cast %39 : vector<1x2x96xf32> to vector<2x96xf32>
    %41 = vector.extract_strided_slice %40 {offsets = [0, 0], sizes = [2, 32], strides = [1, 1]} : vector<2x96xf32> to vector<2x32xf32>
    %42 = vector.extract_strided_slice %38 {offsets = [0, 0], sizes = [2, 32], strides = [1, 1]} : vector<2x96xf32> to vector<2x32xf32>
    %43 = arith.addf %41, %42 : vector<2x32xf32>
    %44 = arith.negf %43 : vector<2x32xf32>
    %45 = math.exp %44 : vector<2x32xf32>
    %cst_14 = arith.constant 1.000000e+00 : f32
    %46 = vector.broadcast %cst_14 : f32 to vector<2x32xf32>
    %47 = arith.addf %46, %45 : vector<2x32xf32>
    %48 = arith.divf %46, %47 : vector<2x32xf32>
    %49 = vector.extract_strided_slice %40 {offsets = [0, 32], sizes = [2, 32], strides = [1, 1]} : vector<2x96xf32> to vector<2x32xf32>
    %50 = vector.extract_strided_slice %38 {offsets = [0, 32], sizes = [2, 32], strides = [1, 1]} : vector<2x96xf32> to vector<2x32xf32>
    %51 = arith.addf %49, %50 : vector<2x32xf32>
    %52 = arith.negf %51 : vector<2x32xf32>
    %53 = math.exp %52 : vector<2x32xf32>
    %cst_15 = arith.constant 1.000000e+00 : f32
    %54 = vector.broadcast %cst_15 : f32 to vector<2x32xf32>
    %55 = arith.addf %54, %53 : vector<2x32xf32>
    %56 = arith.divf %54, %55 : vector<2x32xf32>
    %57 = vector.extract_strided_slice %40 {offsets = [0, 64], sizes = [2, 32], strides = [1, 1]} : vector<2x96xf32> to vector<2x32xf32>
    %58 = vector.extract_strided_slice %38 {offsets = [0, 64], sizes = [2, 32], strides = [1, 1]} : vector<2x96xf32> to vector<2x32xf32>
    %59 = arith.mulf %48, %58 : vector<2x32xf32>
    %60 = arith.addf %57, %59 : vector<2x32xf32>
    %61 = math.tanh %60 : vector<2x32xf32>
    %cst_16 = arith.constant 1.000000e+00 : f32
    %62 = vector.broadcast %cst_16 : f32 to vector<2x32xf32>
    %63 = arith.subf %62, %56 : vector<2x32xf32>
    %64 = arith.mulf %63, %61 : vector<2x32xf32>
    %65 = arith.mulf %56, %34 : vector<2x32xf32>
    %66 = arith.addf %64, %65 : vector<2x32xf32>
    %67 = arith.addf %35, %66 : vector<2x32xf32>
    %cst_17 = arith.constant dense<0.000000e+00> : vector<2x96xf32>
    %68 = tpu.matmul %66, %0, %cst_17 {dimension_numbers = #tpu.dot_dimension_numbers<[1], [0], [0], [1], [0, 0, 1, 1], [], []>} : vector<2x32xf32>, vector<32x96xf32>, vector<2x96xf32> -> vector<2x96xf32>
    %69 = vector.broadcast %1 : vector<1x96xf32> to vector<2x96xf32>
    %70 = arith.addf %68, %69 : vector<2x96xf32>
    %c2 = arith.constant 2 : index
    %c0_18 = arith.constant 0 : index
    %c0_19 = arith.constant 0 : index
    %71 = vector.load %arg0[%c2, %c0_18, %c0_19] : memref<8x2x96xf32, #tpu.memory_space<vmem>>, vector<1x2x96xf32>
    %72 = vector.shape_cast %71 : vector<1x2x96xf32> to vector<2x96xf32>
    %73 = vector.extract_strided_slice %72 {offsets = [0, 0], sizes = [2, 32], strides = [1, 1]} : vector<2x96xf32> to vector<2x32xf32>
    %74 = vector.extract_strided_slice %70 {offsets = [0, 0], sizes = [2, 32], strides = [1, 1]} : vector<2x96xf32> to vector<2x32xf32>
    %75 = arith.addf %73, %74 : vector<2x32xf32>
    %76 = arith.negf %75 : vector<2x32xf32>
    %77 = math.exp %76 : vector<2x32xf32>
    %cst_20 = arith.constant 1.000000e+00 : f32
    %78 = vector.broadcast %cst_20 : f32 to vector<2x32xf32>
    %79 = arith.addf %78, %77 : vector<2x32xf32>
    %80 = arith.divf %78, %79 : vector<2x32xf32>
    %81 = vector.extract_strided_slice %72 {offsets = [0, 32], sizes = [2, 32], strides = [1, 1]} : vector<2x96xf32> to vector<2x32xf32>
    %82 = vector.extract_strided_slice %70 {offsets = [0, 32], sizes = [2, 32], strides = [1, 1]} : vector<2x96xf32> to vector<2x32xf32>
    %83 = arith.addf %81, %82 : vector<2x32xf32>
    %84 = arith.negf %83 : vector<2x32xf32>
    %85 = math.exp %84 : vector<2x32xf32>
    %cst_21 = arith.constant 1.000000e+00 : f32
    %86 = vector.broadcast %cst_21 : f32 to vector<2x32xf32>
    %87 = arith.addf %86, %85 : vector<2x32xf32>
    %88 = arith.divf %86, %87 : vector<2x32xf32>
    %89 = vector.extract_strided_slice %72 {offsets = [0, 64], sizes = [2, 32], strides = [1, 1]} : vector<2x96xf32> to vector<2x32xf32>
    %90 = vector.extract_strided_slice %70 {offsets = [0, 64], sizes = [2, 32], strides = [1, 1]} : vector<2x96xf32> to vector<2x32xf32>
    %91 = arith.mulf %80, %90 : vector<2x32xf32>
    %92 = arith.addf %89, %91 : vector<2x32xf32>
    %93 = math.tanh %92 : vector<2x32xf32>
    %cst_22 = arith.constant 1.000000e+00 : f32
    %94 = vector.broadcast %cst_22 : f32 to vector<2x32xf32>
    %95 = arith.subf %94, %88 : vector<2x32xf32>
    %96 = arith.mulf %95, %93 : vector<2x32xf32>
    %97 = arith.mulf %88, %66 : vector<2x32xf32>
    %98 = arith.addf %96, %97 : vector<2x32xf32>
    %99 = arith.addf %67, %98 : vector<2x32xf32>
    %cst_23 = arith.constant dense<0.000000e+00> : vector<2x96xf32>
    %100 = tpu.matmul %98, %0, %cst_23 {dimension_numbers = #tpu.dot_dimension_numbers<[1], [0], [0], [1], [0, 0, 1, 1], [], []>} : vector<2x32xf32>, vector<32x96xf32>, vector<2x96xf32> -> vector<2x96xf32>
    %101 = vector.broadcast %1 : vector<1x96xf32> to vector<2x96xf32>
    %102 = arith.addf %100, %101 : vector<2x96xf32>
    %c3 = arith.constant 3 : index
    %c0_24 = arith.constant 0 : index
    %c0_25 = arith.constant 0 : index
    %103 = vector.load %arg0[%c3, %c0_24, %c0_25] : memref<8x2x96xf32, #tpu.memory_space<vmem>>, vector<1x2x96xf32>
    %104 = vector.shape_cast %103 : vector<1x2x96xf32> to vector<2x96xf32>
    %105 = vector.extract_strided_slice %104 {offsets = [0, 0], sizes = [2, 32], strides = [1, 1]} : vector<2x96xf32> to vector<2x32xf32>
    %106 = vector.extract_strided_slice %102 {offsets = [0, 0], sizes = [2, 32], strides = [1, 1]} : vector<2x96xf32> to vector<2x32xf32>
    %107 = arith.addf %105, %106 : vector<2x32xf32>
    %108 = arith.negf %107 : vector<2x32xf32>
    %109 = math.exp %108 : vector<2x32xf32>
    %cst_26 = arith.constant 1.000000e+00 : f32
    %110 = vector.broadcast %cst_26 : f32 to vector<2x32xf32>
    %111 = arith.addf %110, %109 : vector<2x32xf32>
    %112 = arith.divf %110, %111 : vector<2x32xf32>
    %113 = vector.extract_strided_slice %104 {offsets = [0, 32], sizes = [2, 32], strides = [1, 1]} : vector<2x96xf32> to vector<2x32xf32>
    %114 = vector.extract_strided_slice %102 {offsets = [0, 32], sizes = [2, 32], strides = [1, 1]} : vector<2x96xf32> to vector<2x32xf32>
    %115 = arith.addf %113, %114 : vector<2x32xf32>
    %116 = arith.negf %115 : vector<2x32xf32>
    %117 = math.exp %116 : vector<2x32xf32>
    %cst_27 = arith.constant 1.000000e+00 : f32
    %118 = vector.broadcast %cst_27 : f32 to vector<2x32xf32>
    %119 = arith.addf %118, %117 : vector<2x32xf32>
    %120 = arith.divf %118, %119 : vector<2x32xf32>
    %121 = vector.extract_strided_slice %104 {offsets = [0, 64], sizes = [2, 32], strides = [1, 1]} : vector<2x96xf32> to vector<2x32xf32>
    %122 = vector.extract_strided_slice %102 {offsets = [0, 64], sizes = [2, 32], strides = [1, 1]} : vector<2x96xf32> to vector<2x32xf32>
    %123 = arith.mulf %112, %122 : vector<2x32xf32>
    %124 = arith.addf %121, %123 : vector<2x32xf32>
    %125 = math.tanh %124 : vector<2x32xf32>
    %cst_28 = arith.constant 1.000000e+00 : f32
    %126 = vector.broadcast %cst_28 : f32 to vector<2x32xf32>
    %127 = arith.subf %126, %120 : vector<2x32xf32>
    %128 = arith.mulf %127, %125 : vector<2x32xf32>
    %129 = arith.mulf %120, %98 : vector<2x32xf32>
    %130 = arith.addf %128, %129 : vector<2x32xf32>
    %131 = arith.addf %99, %130 : vector<2x32xf32>
    %cst_29 = arith.constant dense<0.000000e+00> : vector<2x96xf32>
    %132 = tpu.matmul %130, %0, %cst_29 {dimension_numbers = #tpu.dot_dimension_numbers<[1], [0], [0], [1], [0, 0, 1, 1], [], []>} : vector<2x32xf32>, vector<32x96xf32>, vector<2x96xf32> -> vector<2x96xf32>
    %133 = vector.broadcast %1 : vector<1x96xf32> to vector<2x96xf32>
    %134 = arith.addf %132, %133 : vector<2x96xf32>
    %c4 = arith.constant 4 : index
    %c0_30 = arith.constant 0 : index
    %c0_31 = arith.constant 0 : index
    %135 = vector.load %arg0[%c4, %c0_30, %c0_31] : memref<8x2x96xf32, #tpu.memory_space<vmem>>, vector<1x2x96xf32>
    %136 = vector.shape_cast %135 : vector<1x2x96xf32> to vector<2x96xf32>
    %137 = vector.extract_strided_slice %136 {offsets = [0, 0], sizes = [2, 32], strides = [1, 1]} : vector<2x96xf32> to vector<2x32xf32>
    %138 = vector.extract_strided_slice %134 {offsets = [0, 0], sizes = [2, 32], strides = [1, 1]} : vector<2x96xf32> to vector<2x32xf32>
    %139 = arith.addf %137, %138 : vector<2x32xf32>
    %140 = arith.negf %139 : vector<2x32xf32>
    %141 = math.exp %140 : vector<2x32xf32>
    %cst_32 = arith.constant 1.000000e+00 : f32
    %142 = vector.broadcast %cst_32 : f32 to vector<2x32xf32>
    %143 = arith.addf %142, %141 : vector<2x32xf32>
    %144 = arith.divf %142, %143 : vector<2x32xf32>
    %145 = vector.extract_strided_slice %136 {offsets = [0, 32], sizes = [2, 32], strides = [1, 1]} : vector<2x96xf32> to vector<2x32xf32>
    %146 = vector.extract_strided_slice %134 {offsets = [0, 32], sizes = [2, 32], strides = [1, 1]} : vector<2x96xf32> to vector<2x32xf32>
    %147 = arith.addf %145, %146 : vector<2x32xf32>
    %148 = arith.negf %147 : vector<2x32xf32>
    %149 = math.exp %148 : vector<2x32xf32>
    %cst_33 = arith.constant 1.000000e+00 : f32
    %150 = vector.broadcast %cst_33 : f32 to vector<2x32xf32>
    %151 = arith.addf %150, %149 : vector<2x32xf32>
    %152 = arith.divf %150, %151 : vector<2x32xf32>
    %153 = vector.extract_strided_slice %136 {offsets = [0, 64], sizes = [2, 32], strides = [1, 1]} : vector<2x96xf32> to vector<2x32xf32>
    %154 = vector.extract_strided_slice %134 {offsets = [0, 64], sizes = [2, 32], strides = [1, 1]} : vector<2x96xf32> to vector<2x32xf32>
    %155 = arith.mulf %144, %154 : vector<2x32xf32>
    %156 = arith.addf %153, %155 : vector<2x32xf32>
    %157 = math.tanh %156 : vector<2x32xf32>
    %cst_34 = arith.constant 1.000000e+00 : f32
    %158 = vector.broadcast %cst_34 : f32 to vector<2x32xf32>
    %159 = arith.subf %158, %152 : vector<2x32xf32>
    %160 = arith.mulf %159, %157 : vector<2x32xf32>
    %161 = arith.mulf %152, %130 : vector<2x32xf32>
    %162 = arith.addf %160, %161 : vector<2x32xf32>
    %163 = arith.addf %131, %162 : vector<2x32xf32>
    %cst_35 = arith.constant dense<0.000000e+00> : vector<2x96xf32>
    %164 = tpu.matmul %162, %0, %cst_35 {dimension_numbers = #tpu.dot_dimension_numbers<[1], [0], [0], [1], [0, 0, 1, 1], [], []>} : vector<2x32xf32>, vector<32x96xf32>, vector<2x96xf32> -> vector<2x96xf32>
    %165 = vector.broadcast %1 : vector<1x96xf32> to vector<2x96xf32>
    %166 = arith.addf %164, %165 : vector<2x96xf32>
    %c5 = arith.constant 5 : index
    %c0_36 = arith.constant 0 : index
    %c0_37 = arith.constant 0 : index
    %167 = vector.load %arg0[%c5, %c0_36, %c0_37] : memref<8x2x96xf32, #tpu.memory_space<vmem>>, vector<1x2x96xf32>
    %168 = vector.shape_cast %167 : vector<1x2x96xf32> to vector<2x96xf32>
    %169 = vector.extract_strided_slice %168 {offsets = [0, 0], sizes = [2, 32], strides = [1, 1]} : vector<2x96xf32> to vector<2x32xf32>
    %170 = vector.extract_strided_slice %166 {offsets = [0, 0], sizes = [2, 32], strides = [1, 1]} : vector<2x96xf32> to vector<2x32xf32>
    %171 = arith.addf %169, %170 : vector<2x32xf32>
    %172 = arith.negf %171 : vector<2x32xf32>
    %173 = math.exp %172 : vector<2x32xf32>
    %cst_38 = arith.constant 1.000000e+00 : f32
    %174 = vector.broadcast %cst_38 : f32 to vector<2x32xf32>
    %175 = arith.addf %174, %173 : vector<2x32xf32>
    %176 = arith.divf %174, %175 : vector<2x32xf32>
    %177 = vector.extract_strided_slice %168 {offsets = [0, 32], sizes = [2, 32], strides = [1, 1]} : vector<2x96xf32> to vector<2x32xf32>
    %178 = vector.extract_strided_slice %166 {offsets = [0, 32], sizes = [2, 32], strides = [1, 1]} : vector<2x96xf32> to vector<2x32xf32>
    %179 = arith.addf %177, %178 : vector<2x32xf32>
    %180 = arith.negf %179 : vector<2x32xf32>
    %181 = math.exp %180 : vector<2x32xf32>
    %cst_39 = arith.constant 1.000000e+00 : f32
    %182 = vector.broadcast %cst_39 : f32 to vector<2x32xf32>
    %183 = arith.addf %182, %181 : vector<2x32xf32>
    %184 = arith.divf %182, %183 : vector<2x32xf32>
    %185 = vector.extract_strided_slice %168 {offsets = [0, 64], sizes = [2, 32], strides = [1, 1]} : vector<2x96xf32> to vector<2x32xf32>
    %186 = vector.extract_strided_slice %166 {offsets = [0, 64], sizes = [2, 32], strides = [1, 1]} : vector<2x96xf32> to vector<2x32xf32>
    %187 = arith.mulf %176, %186 : vector<2x32xf32>
    %188 = arith.addf %185, %187 : vector<2x32xf32>
    %189 = math.tanh %188 : vector<2x32xf32>
    %cst_40 = arith.constant 1.000000e+00 : f32
    %190 = vector.broadcast %cst_40 : f32 to vector<2x32xf32>
    %191 = arith.subf %190, %184 : vector<2x32xf32>
    %192 = arith.mulf %191, %189 : vector<2x32xf32>
    %193 = arith.mulf %184, %162 : vector<2x32xf32>
    %194 = arith.addf %192, %193 : vector<2x32xf32>
    %195 = arith.addf %163, %194 : vector<2x32xf32>
    %cst_41 = arith.constant dense<0.000000e+00> : vector<2x96xf32>
    %196 = tpu.matmul %194, %0, %cst_41 {dimension_numbers = #tpu.dot_dimension_numbers<[1], [0], [0], [1], [0, 0, 1, 1], [], []>} : vector<2x32xf32>, vector<32x96xf32>, vector<2x96xf32> -> vector<2x96xf32>
    %197 = vector.broadcast %1 : vector<1x96xf32> to vector<2x96xf32>
    %198 = arith.addf %196, %197 : vector<2x96xf32>
    %c6 = arith.constant 6 : index
    %c0_42 = arith.constant 0 : index
    %c0_43 = arith.constant 0 : index
    %199 = vector.load %arg0[%c6, %c0_42, %c0_43] : memref<8x2x96xf32, #tpu.memory_space<vmem>>, vector<1x2x96xf32>
    %200 = vector.shape_cast %199 : vector<1x2x96xf32> to vector<2x96xf32>
    %201 = vector.extract_strided_slice %200 {offsets = [0, 0], sizes = [2, 32], strides = [1, 1]} : vector<2x96xf32> to vector<2x32xf32>
    %202 = vector.extract_strided_slice %198 {offsets = [0, 0], sizes = [2, 32], strides = [1, 1]} : vector<2x96xf32> to vector<2x32xf32>
    %203 = arith.addf %201, %202 : vector<2x32xf32>
    %204 = arith.negf %203 : vector<2x32xf32>
    %205 = math.exp %204 : vector<2x32xf32>
    %cst_44 = arith.constant 1.000000e+00 : f32
    %206 = vector.broadcast %cst_44 : f32 to vector<2x32xf32>
    %207 = arith.addf %206, %205 : vector<2x32xf32>
    %208 = arith.divf %206, %207 : vector<2x32xf32>
    %209 = vector.extract_strided_slice %200 {offsets = [0, 32], sizes = [2, 32], strides = [1, 1]} : vector<2x96xf32> to vector<2x32xf32>
    %210 = vector.extract_strided_slice %198 {offsets = [0, 32], sizes = [2, 32], strides = [1, 1]} : vector<2x96xf32> to vector<2x32xf32>
    %211 = arith.addf %209, %210 : vector<2x32xf32>
    %212 = arith.negf %211 : vector<2x32xf32>
    %213 = math.exp %212 : vector<2x32xf32>
    %cst_45 = arith.constant 1.000000e+00 : f32
    %214 = vector.broadcast %cst_45 : f32 to vector<2x32xf32>
    %215 = arith.addf %214, %213 : vector<2x32xf32>
    %216 = arith.divf %214, %215 : vector<2x32xf32>
    %217 = vector.extract_strided_slice %200 {offsets = [0, 64], sizes = [2, 32], strides = [1, 1]} : vector<2x96xf32> to vector<2x32xf32>
    %218 = vector.extract_strided_slice %198 {offsets = [0, 64], sizes = [2, 32], strides = [1, 1]} : vector<2x96xf32> to vector<2x32xf32>
    %219 = arith.mulf %208, %218 : vector<2x32xf32>
    %220 = arith.addf %217, %219 : vector<2x32xf32>
    %221 = math.tanh %220 : vector<2x32xf32>
    %cst_46 = arith.constant 1.000000e+00 : f32
    %222 = vector.broadcast %cst_46 : f32 to vector<2x32xf32>
    %223 = arith.subf %222, %216 : vector<2x32xf32>
    %224 = arith.mulf %223, %221 : vector<2x32xf32>
    %225 = arith.mulf %216, %194 : vector<2x32xf32>
    %226 = arith.addf %224, %225 : vector<2x32xf32>
    %227 = arith.addf %195, %226 : vector<2x32xf32>
    %cst_47 = arith.constant dense<0.000000e+00> : vector<2x96xf32>
    %228 = tpu.matmul %226, %0, %cst_47 {dimension_numbers = #tpu.dot_dimension_numbers<[1], [0], [0], [1], [0, 0, 1, 1], [], []>} : vector<2x32xf32>, vector<32x96xf32>, vector<2x96xf32> -> vector<2x96xf32>
    %229 = vector.broadcast %1 : vector<1x96xf32> to vector<2x96xf32>
    %230 = arith.addf %228, %229 : vector<2x96xf32>
    %c7 = arith.constant 7 : index
    %c0_48 = arith.constant 0 : index
    %c0_49 = arith.constant 0 : index
    %231 = vector.load %arg0[%c7, %c0_48, %c0_49] : memref<8x2x96xf32, #tpu.memory_space<vmem>>, vector<1x2x96xf32>
    %232 = vector.shape_cast %231 : vector<1x2x96xf32> to vector<2x96xf32>
    %233 = vector.extract_strided_slice %232 {offsets = [0, 0], sizes = [2, 32], strides = [1, 1]} : vector<2x96xf32> to vector<2x32xf32>
    %234 = vector.extract_strided_slice %230 {offsets = [0, 0], sizes = [2, 32], strides = [1, 1]} : vector<2x96xf32> to vector<2x32xf32>
    %235 = arith.addf %233, %234 : vector<2x32xf32>
    %236 = arith.negf %235 : vector<2x32xf32>
    %237 = math.exp %236 : vector<2x32xf32>
    %cst_50 = arith.constant 1.000000e+00 : f32
    %238 = vector.broadcast %cst_50 : f32 to vector<2x32xf32>
    %239 = arith.addf %238, %237 : vector<2x32xf32>
    %240 = arith.divf %238, %239 : vector<2x32xf32>
    %241 = vector.extract_strided_slice %232 {offsets = [0, 32], sizes = [2, 32], strides = [1, 1]} : vector<2x96xf32> to vector<2x32xf32>
    %242 = vector.extract_strided_slice %230 {offsets = [0, 32], sizes = [2, 32], strides = [1, 1]} : vector<2x96xf32> to vector<2x32xf32>
    %243 = arith.addf %241, %242 : vector<2x32xf32>
    %244 = arith.negf %243 : vector<2x32xf32>
    %245 = math.exp %244 : vector<2x32xf32>
    %cst_51 = arith.constant 1.000000e+00 : f32
    %246 = vector.broadcast %cst_51 : f32 to vector<2x32xf32>
    %247 = arith.addf %246, %245 : vector<2x32xf32>
    %248 = arith.divf %246, %247 : vector<2x32xf32>
    %249 = vector.extract_strided_slice %232 {offsets = [0, 64], sizes = [2, 32], strides = [1, 1]} : vector<2x96xf32> to vector<2x32xf32>
    %250 = vector.extract_strided_slice %230 {offsets = [0, 64], sizes = [2, 32], strides = [1, 1]} : vector<2x96xf32> to vector<2x32xf32>
    %251 = arith.mulf %240, %250 : vector<2x32xf32>
    %252 = arith.addf %249, %251 : vector<2x32xf32>
    %253 = math.tanh %252 : vector<2x32xf32>
    %cst_52 = arith.constant 1.000000e+00 : f32
    %254 = vector.broadcast %cst_52 : f32 to vector<2x32xf32>
    %255 = arith.subf %254, %248 : vector<2x32xf32>
    %256 = arith.mulf %255, %253 : vector<2x32xf32>
    %257 = arith.mulf %248, %226 : vector<2x32xf32>
    %258 = arith.addf %256, %257 : vector<2x32xf32>
    %259 = arith.addf %227, %258 : vector<2x32xf32>
    %c0_53 = arith.constant 0 : index
    %c0_54 = arith.constant 0 : index
    %260 = vector.load %arg4[%c0_53, %c0_54] : memref<32x32xf32, #tpu.memory_space<vmem>>, vector<32x32xf32>
    %cst_55 = arith.constant dense<0.000000e+00> : vector<2x32xf32>
    %261 = tpu.matmul %259, %260, %cst_55 {dimension_numbers = #tpu.dot_dimension_numbers<[1], [0], [0], [1], [0, 0, 1, 1], [], []>} : vector<2x32xf32>, vector<32x32xf32>, vector<2x32xf32> -> vector<2x32xf32>
    %c0_56 = arith.constant 0 : index
    %c0_57 = arith.constant 0 : index
    %262 = vector.load %arg5[%c0_56, %c0_57] : memref<32x96xf32, #tpu.memory_space<vmem>>, vector<32x96xf32>
    %c0_58 = arith.constant 0 : index
    %c0_59 = arith.constant 0 : index
    %263 = vector.load %arg6[%c0_58, %c0_59] : memref<1x96xf32, #tpu.memory_space<vmem>>, vector<1x96xf32>
    %c0_60 = arith.constant 0 : index
    %c0_61 = arith.constant 0 : index
    %c0_62 = arith.constant 0 : index
    %264 = vector.load %arg1[%c0_60, %c0_61, %c0_62] : memref<8x2x32xf32, #tpu.memory_space<vmem>>, vector<1x2x32xf32>
    %265 = vector.shape_cast %264 : vector<1x2x32xf32> to vector<2x32xf32>
    %266 = arith.addf %265, %261 : vector<2x32xf32>
    %cst_63 = arith.constant 0.000000e+00 : f32
    %267 = vector.broadcast %cst_63 : f32 to vector<2x32xf32>
    %268 = arith.maximumf %266, %267 : vector<2x32xf32>
    %cst_64 = arith.constant dense<0.000000e+00> : vector<2x96xf32>
    %269 = tpu.matmul %268, %262, %cst_64 {dimension_numbers = #tpu.dot_dimension_numbers<[1], [0], [0], [1], [0, 0, 1, 1], [], []>} : vector<2x32xf32>, vector<32x96xf32>, vector<2x96xf32> -> vector<2x96xf32>
    %270 = vector.broadcast %263 : vector<1x96xf32> to vector<2x96xf32>
    %271 = arith.addf %269, %270 : vector<2x96xf32>
    %c1_65 = arith.constant 1 : index
    %c0_66 = arith.constant 0 : index
    %c0_67 = arith.constant 0 : index
    %272 = vector.load %arg1[%c1_65, %c0_66, %c0_67] : memref<8x2x32xf32, #tpu.memory_space<vmem>>, vector<1x2x32xf32>
    %273 = vector.shape_cast %272 : vector<1x2x32xf32> to vector<2x32xf32>
    %274 = arith.addf %273, %261 : vector<2x32xf32>
    %cst_68 = arith.constant 0.000000e+00 : f32
    %275 = vector.broadcast %cst_68 : f32 to vector<2x32xf32>
    %276 = arith.maximumf %274, %275 : vector<2x32xf32>
    %cst_69 = arith.constant dense<0.000000e+00> : vector<2x96xf32>
    %277 = tpu.matmul %276, %262, %cst_69 {dimension_numbers = #tpu.dot_dimension_numbers<[1], [0], [0], [1], [0, 0, 1, 1], [], []>} : vector<2x32xf32>, vector<32x96xf32>, vector<2x96xf32> -> vector<2x96xf32>
    %278 = vector.broadcast %263 : vector<1x96xf32> to vector<2x96xf32>
    %279 = arith.addf %277, %278 : vector<2x96xf32>
    %c2_70 = arith.constant 2 : index
    %c0_71 = arith.constant 0 : index
    %c0_72 = arith.constant 0 : index
    %280 = vector.load %arg1[%c2_70, %c0_71, %c0_72] : memref<8x2x32xf32, #tpu.memory_space<vmem>>, vector<1x2x32xf32>
    %281 = vector.shape_cast %280 : vector<1x2x32xf32> to vector<2x32xf32>
    %282 = arith.addf %281, %261 : vector<2x32xf32>
    %cst_73 = arith.constant 0.000000e+00 : f32
    %283 = vector.broadcast %cst_73 : f32 to vector<2x32xf32>
    %284 = arith.maximumf %282, %283 : vector<2x32xf32>
    %cst_74 = arith.constant dense<0.000000e+00> : vector<2x96xf32>
    %285 = tpu.matmul %284, %262, %cst_74 {dimension_numbers = #tpu.dot_dimension_numbers<[1], [0], [0], [1], [0, 0, 1, 1], [], []>} : vector<2x32xf32>, vector<32x96xf32>, vector<2x96xf32> -> vector<2x96xf32>
    %286 = vector.broadcast %263 : vector<1x96xf32> to vector<2x96xf32>
    %287 = arith.addf %285, %286 : vector<2x96xf32>
    %c3_75 = arith.constant 3 : index
    %c0_76 = arith.constant 0 : index
    %c0_77 = arith.constant 0 : index
    %288 = vector.load %arg1[%c3_75, %c0_76, %c0_77] : memref<8x2x32xf32, #tpu.memory_space<vmem>>, vector<1x2x32xf32>
    %289 = vector.shape_cast %288 : vector<1x2x32xf32> to vector<2x32xf32>
    %290 = arith.addf %289, %261 : vector<2x32xf32>
    %cst_78 = arith.constant 0.000000e+00 : f32
    %291 = vector.broadcast %cst_78 : f32 to vector<2x32xf32>
    %292 = arith.maximumf %290, %291 : vector<2x32xf32>
    %cst_79 = arith.constant dense<0.000000e+00> : vector<2x96xf32>
    %293 = tpu.matmul %292, %262, %cst_79 {dimension_numbers = #tpu.dot_dimension_numbers<[1], [0], [0], [1], [0, 0, 1, 1], [], []>} : vector<2x32xf32>, vector<32x96xf32>, vector<2x96xf32> -> vector<2x96xf32>
    %294 = vector.broadcast %263 : vector<1x96xf32> to vector<2x96xf32>
    %295 = arith.addf %293, %294 : vector<2x96xf32>
    %c4_80 = arith.constant 4 : index
    %c0_81 = arith.constant 0 : index
    %c0_82 = arith.constant 0 : index
    %296 = vector.load %arg1[%c4_80, %c0_81, %c0_82] : memref<8x2x32xf32, #tpu.memory_space<vmem>>, vector<1x2x32xf32>
    %297 = vector.shape_cast %296 : vector<1x2x32xf32> to vector<2x32xf32>
    %298 = arith.addf %297, %261 : vector<2x32xf32>
    %cst_83 = arith.constant 0.000000e+00 : f32
    %299 = vector.broadcast %cst_83 : f32 to vector<2x32xf32>
    %300 = arith.maximumf %298, %299 : vector<2x32xf32>
    %cst_84 = arith.constant dense<0.000000e+00> : vector<2x96xf32>
    %301 = tpu.matmul %300, %262, %cst_84 {dimension_numbers = #tpu.dot_dimension_numbers<[1], [0], [0], [1], [0, 0, 1, 1], [], []>} : vector<2x32xf32>, vector<32x96xf32>, vector<2x96xf32> -> vector<2x96xf32>
    %302 = vector.broadcast %263 : vector<1x96xf32> to vector<2x96xf32>
    %303 = arith.addf %301, %302 : vector<2x96xf32>
    %c5_85 = arith.constant 5 : index
    %c0_86 = arith.constant 0 : index
    %c0_87 = arith.constant 0 : index
    %304 = vector.load %arg1[%c5_85, %c0_86, %c0_87] : memref<8x2x32xf32, #tpu.memory_space<vmem>>, vector<1x2x32xf32>
    %305 = vector.shape_cast %304 : vector<1x2x32xf32> to vector<2x32xf32>
    %306 = arith.addf %305, %261 : vector<2x32xf32>
    %cst_88 = arith.constant 0.000000e+00 : f32
    %307 = vector.broadcast %cst_88 : f32 to vector<2x32xf32>
    %308 = arith.maximumf %306, %307 : vector<2x32xf32>
    %cst_89 = arith.constant dense<0.000000e+00> : vector<2x96xf32>
    %309 = tpu.matmul %308, %262, %cst_89 {dimension_numbers = #tpu.dot_dimension_numbers<[1], [0], [0], [1], [0, 0, 1, 1], [], []>} : vector<2x32xf32>, vector<32x96xf32>, vector<2x96xf32> -> vector<2x96xf32>
    %310 = vector.broadcast %263 : vector<1x96xf32> to vector<2x96xf32>
    %311 = arith.addf %309, %310 : vector<2x96xf32>
    %c6_90 = arith.constant 6 : index
    %c0_91 = arith.constant 0 : index
    %c0_92 = arith.constant 0 : index
    %312 = vector.load %arg1[%c6_90, %c0_91, %c0_92] : memref<8x2x32xf32, #tpu.memory_space<vmem>>, vector<1x2x32xf32>
    %313 = vector.shape_cast %312 : vector<1x2x32xf32> to vector<2x32xf32>
    %314 = arith.addf %313, %261 : vector<2x32xf32>
    %cst_93 = arith.constant 0.000000e+00 : f32
    %315 = vector.broadcast %cst_93 : f32 to vector<2x32xf32>
    %316 = arith.maximumf %314, %315 : vector<2x32xf32>
    %cst_94 = arith.constant dense<0.000000e+00> : vector<2x96xf32>
    %317 = tpu.matmul %316, %262, %cst_94 {dimension_numbers = #tpu.dot_dimension_numbers<[1], [0], [0], [1], [0, 0, 1, 1], [], []>} : vector<2x32xf32>, vector<32x96xf32>, vector<2x96xf32> -> vector<2x96xf32>
    %318 = vector.broadcast %263 : vector<1x96xf32> to vector<2x96xf32>
    %319 = arith.addf %317, %318 : vector<2x96xf32>
    %c7_95 = arith.constant 7 : index
    %c0_96 = arith.constant 0 : index
    %c0_97 = arith.constant 0 : index
    %320 = vector.load %arg1[%c7_95, %c0_96, %c0_97] : memref<8x2x32xf32, #tpu.memory_space<vmem>>, vector<1x2x32xf32>
    %321 = vector.shape_cast %320 : vector<1x2x32xf32> to vector<2x32xf32>
    %322 = arith.addf %321, %261 : vector<2x32xf32>
    %cst_98 = arith.constant 0.000000e+00 : f32
    %323 = vector.broadcast %cst_98 : f32 to vector<2x32xf32>
    %324 = arith.maximumf %322, %323 : vector<2x32xf32>
    %cst_99 = arith.constant dense<0.000000e+00> : vector<2x96xf32>
    %325 = tpu.matmul %324, %262, %cst_99 {dimension_numbers = #tpu.dot_dimension_numbers<[1], [0], [0], [1], [0, 0, 1, 1], [], []>} : vector<2x32xf32>, vector<32x96xf32>, vector<2x96xf32> -> vector<2x96xf32>
    %326 = vector.broadcast %263 : vector<1x96xf32> to vector<2x96xf32>
    %327 = arith.addf %325, %326 : vector<2x96xf32>
    %c0_100 = arith.constant 0 : index
    %c0_101 = arith.constant 0 : index
    %328 = vector.load %arg7[%c0_100, %c0_101] : memref<32x96xf32, #tpu.memory_space<vmem>>, vector<32x96xf32>
    %c0_102 = arith.constant 0 : index
    %c0_103 = arith.constant 0 : index
    %329 = vector.load %arg8[%c0_102, %c0_103] : memref<1x96xf32, #tpu.memory_space<vmem>>, vector<1x96xf32>
    %cst_104 = arith.constant dense<0.000000e+00> : vector<2x96xf32>
    %330 = tpu.matmul %258, %328, %cst_104 {dimension_numbers = #tpu.dot_dimension_numbers<[1], [0], [0], [1], [0, 0, 1, 1], [], []>} : vector<2x32xf32>, vector<32x96xf32>, vector<2x96xf32> -> vector<2x96xf32>
    %331 = vector.broadcast %329 : vector<1x96xf32> to vector<2x96xf32>
    %332 = arith.addf %330, %331 : vector<2x96xf32>
    %333 = vector.extract_strided_slice %271 {offsets = [0, 0], sizes = [2, 32], strides = [1, 1]} : vector<2x96xf32> to vector<2x32xf32>
    %334 = vector.extract_strided_slice %332 {offsets = [0, 0], sizes = [2, 32], strides = [1, 1]} : vector<2x96xf32> to vector<2x32xf32>
    %335 = arith.addf %333, %334 : vector<2x32xf32>
    %336 = arith.negf %335 : vector<2x32xf32>
    %337 = math.exp %336 : vector<2x32xf32>
    %cst_105 = arith.constant 1.000000e+00 : f32
    %338 = vector.broadcast %cst_105 : f32 to vector<2x32xf32>
    %339 = arith.addf %338, %337 : vector<2x32xf32>
    %340 = arith.divf %338, %339 : vector<2x32xf32>
    %341 = vector.extract_strided_slice %271 {offsets = [0, 32], sizes = [2, 32], strides = [1, 1]} : vector<2x96xf32> to vector<2x32xf32>
    %342 = vector.extract_strided_slice %332 {offsets = [0, 32], sizes = [2, 32], strides = [1, 1]} : vector<2x96xf32> to vector<2x32xf32>
    %343 = arith.addf %341, %342 : vector<2x32xf32>
    %344 = arith.negf %343 : vector<2x32xf32>
    %345 = math.exp %344 : vector<2x32xf32>
    %cst_106 = arith.constant 1.000000e+00 : f32
    %346 = vector.broadcast %cst_106 : f32 to vector<2x32xf32>
    %347 = arith.addf %346, %345 : vector<2x32xf32>
    %348 = arith.divf %346, %347 : vector<2x32xf32>
    %349 = vector.extract_strided_slice %271 {offsets = [0, 64], sizes = [2, 32], strides = [1, 1]} : vector<2x96xf32> to vector<2x32xf32>
    %350 = vector.extract_strided_slice %332 {offsets = [0, 64], sizes = [2, 32], strides = [1, 1]} : vector<2x96xf32> to vector<2x32xf32>
    %351 = arith.mulf %340, %350 : vector<2x32xf32>
    %352 = arith.addf %349, %351 : vector<2x32xf32>
    %353 = math.tanh %352 : vector<2x32xf32>
    %cst_107 = arith.constant 1.000000e+00 : f32
    %354 = vector.broadcast %cst_107 : f32 to vector<2x32xf32>
    %355 = arith.subf %354, %348 : vector<2x32xf32>
    %356 = arith.mulf %355, %353 : vector<2x32xf32>
    %357 = arith.mulf %348, %258 : vector<2x32xf32>
    %358 = arith.addf %356, %357 : vector<2x32xf32>
    %cst_108 = arith.constant dense<0.000000e+00> : vector<2x96xf32>
    %359 = tpu.matmul %358, %328, %cst_108 {dimension_numbers = #tpu.dot_dimension_numbers<[1], [0], [0], [1], [0, 0, 1, 1], [], []>} : vector<2x32xf32>, vector<32x96xf32>, vector<2x96xf32> -> vector<2x96xf32>
    %360 = vector.broadcast %329 : vector<1x96xf32> to vector<2x96xf32>
    %361 = arith.addf %359, %360 : vector<2x96xf32>
    %362 = vector.extract_strided_slice %279 {offsets = [0, 0], sizes = [2, 32], strides = [1, 1]} : vector<2x96xf32> to vector<2x32xf32>
    %363 = vector.extract_strided_slice %361 {offsets = [0, 0], sizes = [2, 32], strides = [1, 1]} : vector<2x96xf32> to vector<2x32xf32>
    %364 = arith.addf %362, %363 : vector<2x32xf32>
    %365 = arith.negf %364 : vector<2x32xf32>
    %366 = math.exp %365 : vector<2x32xf32>
    %cst_109 = arith.constant 1.000000e+00 : f32
    %367 = vector.broadcast %cst_109 : f32 to vector<2x32xf32>
    %368 = arith.addf %367, %366 : vector<2x32xf32>
    %369 = arith.divf %367, %368 : vector<2x32xf32>
    %370 = vector.extract_strided_slice %279 {offsets = [0, 32], sizes = [2, 32], strides = [1, 1]} : vector<2x96xf32> to vector<2x32xf32>
    %371 = vector.extract_strided_slice %361 {offsets = [0, 32], sizes = [2, 32], strides = [1, 1]} : vector<2x96xf32> to vector<2x32xf32>
    %372 = arith.addf %370, %371 : vector<2x32xf32>
    %373 = arith.negf %372 : vector<2x32xf32>
    %374 = math.exp %373 : vector<2x32xf32>
    %cst_110 = arith.constant 1.000000e+00 : f32
    %375 = vector.broadcast %cst_110 : f32 to vector<2x32xf32>
    %376 = arith.addf %375, %374 : vector<2x32xf32>
    %377 = arith.divf %375, %376 : vector<2x32xf32>
    %378 = vector.extract_strided_slice %279 {offsets = [0, 64], sizes = [2, 32], strides = [1, 1]} : vector<2x96xf32> to vector<2x32xf32>
    %379 = vector.extract_strided_slice %361 {offsets = [0, 64], sizes = [2, 32], strides = [1, 1]} : vector<2x96xf32> to vector<2x32xf32>
    %380 = arith.mulf %369, %379 : vector<2x32xf32>
    %381 = arith.addf %378, %380 : vector<2x32xf32>
    %382 = math.tanh %381 : vector<2x32xf32>
    %cst_111 = arith.constant 1.000000e+00 : f32
    %383 = vector.broadcast %cst_111 : f32 to vector<2x32xf32>
    %384 = arith.subf %383, %377 : vector<2x32xf32>
    %385 = arith.mulf %384, %382 : vector<2x32xf32>
    %386 = arith.mulf %377, %358 : vector<2x32xf32>
    %387 = arith.addf %385, %386 : vector<2x32xf32>
    %cst_112 = arith.constant dense<0.000000e+00> : vector<2x96xf32>
    %388 = tpu.matmul %387, %328, %cst_112 {dimension_numbers = #tpu.dot_dimension_numbers<[1], [0], [0], [1], [0, 0, 1, 1], [], []>} : vector<2x32xf32>, vector<32x96xf32>, vector<2x96xf32> -> vector<2x96xf32>
    %389 = vector.broadcast %329 : vector<1x96xf32> to vector<2x96xf32>
    %390 = arith.addf %388, %389 : vector<2x96xf32>
    %391 = vector.extract_strided_slice %287 {offsets = [0, 0], sizes = [2, 32], strides = [1, 1]} : vector<2x96xf32> to vector<2x32xf32>
    %392 = vector.extract_strided_slice %390 {offsets = [0, 0], sizes = [2, 32], strides = [1, 1]} : vector<2x96xf32> to vector<2x32xf32>
    %393 = arith.addf %391, %392 : vector<2x32xf32>
    %394 = arith.negf %393 : vector<2x32xf32>
    %395 = math.exp %394 : vector<2x32xf32>
    %cst_113 = arith.constant 1.000000e+00 : f32
    %396 = vector.broadcast %cst_113 : f32 to vector<2x32xf32>
    %397 = arith.addf %396, %395 : vector<2x32xf32>
    %398 = arith.divf %396, %397 : vector<2x32xf32>
    %399 = vector.extract_strided_slice %287 {offsets = [0, 32], sizes = [2, 32], strides = [1, 1]} : vector<2x96xf32> to vector<2x32xf32>
    %400 = vector.extract_strided_slice %390 {offsets = [0, 32], sizes = [2, 32], strides = [1, 1]} : vector<2x96xf32> to vector<2x32xf32>
    %401 = arith.addf %399, %400 : vector<2x32xf32>
    %402 = arith.negf %401 : vector<2x32xf32>
    %403 = math.exp %402 : vector<2x32xf32>
    %cst_114 = arith.constant 1.000000e+00 : f32
    %404 = vector.broadcast %cst_114 : f32 to vector<2x32xf32>
    %405 = arith.addf %404, %403 : vector<2x32xf32>
    %406 = arith.divf %404, %405 : vector<2x32xf32>
    %407 = vector.extract_strided_slice %287 {offsets = [0, 64], sizes = [2, 32], strides = [1, 1]} : vector<2x96xf32> to vector<2x32xf32>
    %408 = vector.extract_strided_slice %390 {offsets = [0, 64], sizes = [2, 32], strides = [1, 1]} : vector<2x96xf32> to vector<2x32xf32>
    %409 = arith.mulf %398, %408 : vector<2x32xf32>
    %410 = arith.addf %407, %409 : vector<2x32xf32>
    %411 = math.tanh %410 : vector<2x32xf32>
    %cst_115 = arith.constant 1.000000e+00 : f32
    %412 = vector.broadcast %cst_115 : f32 to vector<2x32xf32>
    %413 = arith.subf %412, %406 : vector<2x32xf32>
    %414 = arith.mulf %413, %411 : vector<2x32xf32>
    %415 = arith.mulf %406, %387 : vector<2x32xf32>
    %416 = arith.addf %414, %415 : vector<2x32xf32>
    %cst_116 = arith.constant dense<0.000000e+00> : vector<2x96xf32>
    %417 = tpu.matmul %416, %328, %cst_116 {dimension_numbers = #tpu.dot_dimension_numbers<[1], [0], [0], [1], [0, 0, 1, 1], [], []>} : vector<2x32xf32>, vector<32x96xf32>, vector<2x96xf32> -> vector<2x96xf32>
    %418 = vector.broadcast %329 : vector<1x96xf32> to vector<2x96xf32>
    %419 = arith.addf %417, %418 : vector<2x96xf32>
    %420 = vector.extract_strided_slice %295 {offsets = [0, 0], sizes = [2, 32], strides = [1, 1]} : vector<2x96xf32> to vector<2x32xf32>
    %421 = vector.extract_strided_slice %419 {offsets = [0, 0], sizes = [2, 32], strides = [1, 1]} : vector<2x96xf32> to vector<2x32xf32>
    %422 = arith.addf %420, %421 : vector<2x32xf32>
    %423 = arith.negf %422 : vector<2x32xf32>
    %424 = math.exp %423 : vector<2x32xf32>
    %cst_117 = arith.constant 1.000000e+00 : f32
    %425 = vector.broadcast %cst_117 : f32 to vector<2x32xf32>
    %426 = arith.addf %425, %424 : vector<2x32xf32>
    %427 = arith.divf %425, %426 : vector<2x32xf32>
    %428 = vector.extract_strided_slice %295 {offsets = [0, 32], sizes = [2, 32], strides = [1, 1]} : vector<2x96xf32> to vector<2x32xf32>
    %429 = vector.extract_strided_slice %419 {offsets = [0, 32], sizes = [2, 32], strides = [1, 1]} : vector<2x96xf32> to vector<2x32xf32>
    %430 = arith.addf %428, %429 : vector<2x32xf32>
    %431 = arith.negf %430 : vector<2x32xf32>
    %432 = math.exp %431 : vector<2x32xf32>
    %cst_118 = arith.constant 1.000000e+00 : f32
    %433 = vector.broadcast %cst_118 : f32 to vector<2x32xf32>
    %434 = arith.addf %433, %432 : vector<2x32xf32>
    %435 = arith.divf %433, %434 : vector<2x32xf32>
    %436 = vector.extract_strided_slice %295 {offsets = [0, 64], sizes = [2, 32], strides = [1, 1]} : vector<2x96xf32> to vector<2x32xf32>
    %437 = vector.extract_strided_slice %419 {offsets = [0, 64], sizes = [2, 32], strides = [1, 1]} : vector<2x96xf32> to vector<2x32xf32>
    %438 = arith.mulf %427, %437 : vector<2x32xf32>
    %439 = arith.addf %436, %438 : vector<2x32xf32>
    %440 = math.tanh %439 : vector<2x32xf32>
    %cst_119 = arith.constant 1.000000e+00 : f32
    %441 = vector.broadcast %cst_119 : f32 to vector<2x32xf32>
    %442 = arith.subf %441, %435 : vector<2x32xf32>
    %443 = arith.mulf %442, %440 : vector<2x32xf32>
    %444 = arith.mulf %435, %416 : vector<2x32xf32>
    %445 = arith.addf %443, %444 : vector<2x32xf32>
    %cst_120 = arith.constant dense<0.000000e+00> : vector<2x96xf32>
    %446 = tpu.matmul %445, %328, %cst_120 {dimension_numbers = #tpu.dot_dimension_numbers<[1], [0], [0], [1], [0, 0, 1, 1], [], []>} : vector<2x32xf32>, vector<32x96xf32>, vector<2x96xf32> -> vector<2x96xf32>
    %447 = vector.broadcast %329 : vector<1x96xf32> to vector<2x96xf32>
    %448 = arith.addf %446, %447 : vector<2x96xf32>
    %449 = vector.extract_strided_slice %303 {offsets = [0, 0], sizes = [2, 32], strides = [1, 1]} : vector<2x96xf32> to vector<2x32xf32>
    %450 = vector.extract_strided_slice %448 {offsets = [0, 0], sizes = [2, 32], strides = [1, 1]} : vector<2x96xf32> to vector<2x32xf32>
    %451 = arith.addf %449, %450 : vector<2x32xf32>
    %452 = arith.negf %451 : vector<2x32xf32>
    %453 = math.exp %452 : vector<2x32xf32>
    %cst_121 = arith.constant 1.000000e+00 : f32
    %454 = vector.broadcast %cst_121 : f32 to vector<2x32xf32>
    %455 = arith.addf %454, %453 : vector<2x32xf32>
    %456 = arith.divf %454, %455 : vector<2x32xf32>
    %457 = vector.extract_strided_slice %303 {offsets = [0, 32], sizes = [2, 32], strides = [1, 1]} : vector<2x96xf32> to vector<2x32xf32>
    %458 = vector.extract_strided_slice %448 {offsets = [0, 32], sizes = [2, 32], strides = [1, 1]} : vector<2x96xf32> to vector<2x32xf32>
    %459 = arith.addf %457, %458 : vector<2x32xf32>
    %460 = arith.negf %459 : vector<2x32xf32>
    %461 = math.exp %460 : vector<2x32xf32>
    %cst_122 = arith.constant 1.000000e+00 : f32
    %462 = vector.broadcast %cst_122 : f32 to vector<2x32xf32>
    %463 = arith.addf %462, %461 : vector<2x32xf32>
    %464 = arith.divf %462, %463 : vector<2x32xf32>
    %465 = vector.extract_strided_slice %303 {offsets = [0, 64], sizes = [2, 32], strides = [1, 1]} : vector<2x96xf32> to vector<2x32xf32>
    %466 = vector.extract_strided_slice %448 {offsets = [0, 64], sizes = [2, 32], strides = [1, 1]} : vector<2x96xf32> to vector<2x32xf32>
    %467 = arith.mulf %456, %466 : vector<2x32xf32>
    %468 = arith.addf %465, %467 : vector<2x32xf32>
    %469 = math.tanh %468 : vector<2x32xf32>
    %cst_123 = arith.constant 1.000000e+00 : f32
    %470 = vector.broadcast %cst_123 : f32 to vector<2x32xf32>
    %471 = arith.subf %470, %464 : vector<2x32xf32>
    %472 = arith.mulf %471, %469 : vector<2x32xf32>
    %473 = arith.mulf %464, %445 : vector<2x32xf32>
    %474 = arith.addf %472, %473 : vector<2x32xf32>
    %cst_124 = arith.constant dense<0.000000e+00> : vector<2x96xf32>
    %475 = tpu.matmul %474, %328, %cst_124 {dimension_numbers = #tpu.dot_dimension_numbers<[1], [0], [0], [1], [0, 0, 1, 1], [], []>} : vector<2x32xf32>, vector<32x96xf32>, vector<2x96xf32> -> vector<2x96xf32>
    %476 = vector.broadcast %329 : vector<1x96xf32> to vector<2x96xf32>
    %477 = arith.addf %475, %476 : vector<2x96xf32>
    %478 = vector.extract_strided_slice %311 {offsets = [0, 0], sizes = [2, 32], strides = [1, 1]} : vector<2x96xf32> to vector<2x32xf32>
    %479 = vector.extract_strided_slice %477 {offsets = [0, 0], sizes = [2, 32], strides = [1, 1]} : vector<2x96xf32> to vector<2x32xf32>
    %480 = arith.addf %478, %479 : vector<2x32xf32>
    %481 = arith.negf %480 : vector<2x32xf32>
    %482 = math.exp %481 : vector<2x32xf32>
    %cst_125 = arith.constant 1.000000e+00 : f32
    %483 = vector.broadcast %cst_125 : f32 to vector<2x32xf32>
    %484 = arith.addf %483, %482 : vector<2x32xf32>
    %485 = arith.divf %483, %484 : vector<2x32xf32>
    %486 = vector.extract_strided_slice %311 {offsets = [0, 32], sizes = [2, 32], strides = [1, 1]} : vector<2x96xf32> to vector<2x32xf32>
    %487 = vector.extract_strided_slice %477 {offsets = [0, 32], sizes = [2, 32], strides = [1, 1]} : vector<2x96xf32> to vector<2x32xf32>
    %488 = arith.addf %486, %487 : vector<2x32xf32>
    %489 = arith.negf %488 : vector<2x32xf32>
    %490 = math.exp %489 : vector<2x32xf32>
    %cst_126 = arith.constant 1.000000e+00 : f32
    %491 = vector.broadcast %cst_126 : f32 to vector<2x32xf32>
    %492 = arith.addf %491, %490 : vector<2x32xf32>
    %493 = arith.divf %491, %492 : vector<2x32xf32>
    %494 = vector.extract_strided_slice %311 {offsets = [0, 64], sizes = [2, 32], strides = [1, 1]} : vector<2x96xf32> to vector<2x32xf32>
    %495 = vector.extract_strided_slice %477 {offsets = [0, 64], sizes = [2, 32], strides = [1, 1]} : vector<2x96xf32> to vector<2x32xf32>
    %496 = arith.mulf %485, %495 : vector<2x32xf32>
    %497 = arith.addf %494, %496 : vector<2x32xf32>
    %498 = math.tanh %497 : vector<2x32xf32>
    %cst_127 = arith.constant 1.000000e+00 : f32
    %499 = vector.broadcast %cst_127 : f32 to vector<2x32xf32>
    %500 = arith.subf %499, %493 : vector<2x32xf32>
    %501 = arith.mulf %500, %498 : vector<2x32xf32>
    %502 = arith.mulf %493, %474 : vector<2x32xf32>
    %503 = arith.addf %501, %502 : vector<2x32xf32>
    %cst_128 = arith.constant dense<0.000000e+00> : vector<2x96xf32>
    %504 = tpu.matmul %503, %328, %cst_128 {dimension_numbers = #tpu.dot_dimension_numbers<[1], [0], [0], [1], [0, 0, 1, 1], [], []>} : vector<2x32xf32>, vector<32x96xf32>, vector<2x96xf32> -> vector<2x96xf32>
    %505 = vector.broadcast %329 : vector<1x96xf32> to vector<2x96xf32>
    %506 = arith.addf %504, %505 : vector<2x96xf32>
    %507 = vector.extract_strided_slice %319 {offsets = [0, 0], sizes = [2, 32], strides = [1, 1]} : vector<2x96xf32> to vector<2x32xf32>
    %508 = vector.extract_strided_slice %506 {offsets = [0, 0], sizes = [2, 32], strides = [1, 1]} : vector<2x96xf32> to vector<2x32xf32>
    %509 = arith.addf %507, %508 : vector<2x32xf32>
    %510 = arith.negf %509 : vector<2x32xf32>
    %511 = math.exp %510 : vector<2x32xf32>
    %cst_129 = arith.constant 1.000000e+00 : f32
    %512 = vector.broadcast %cst_129 : f32 to vector<2x32xf32>
    %513 = arith.addf %512, %511 : vector<2x32xf32>
    %514 = arith.divf %512, %513 : vector<2x32xf32>
    %515 = vector.extract_strided_slice %319 {offsets = [0, 32], sizes = [2, 32], strides = [1, 1]} : vector<2x96xf32> to vector<2x32xf32>
    %516 = vector.extract_strided_slice %506 {offsets = [0, 32], sizes = [2, 32], strides = [1, 1]} : vector<2x96xf32> to vector<2x32xf32>
    %517 = arith.addf %515, %516 : vector<2x32xf32>
    %518 = arith.negf %517 : vector<2x32xf32>
    %519 = math.exp %518 : vector<2x32xf32>
    %cst_130 = arith.constant 1.000000e+00 : f32
    %520 = vector.broadcast %cst_130 : f32 to vector<2x32xf32>
    %521 = arith.addf %520, %519 : vector<2x32xf32>
    %522 = arith.divf %520, %521 : vector<2x32xf32>
    %523 = vector.extract_strided_slice %319 {offsets = [0, 64], sizes = [2, 32], strides = [1, 1]} : vector<2x96xf32> to vector<2x32xf32>
    %524 = vector.extract_strided_slice %506 {offsets = [0, 64], sizes = [2, 32], strides = [1, 1]} : vector<2x96xf32> to vector<2x32xf32>
    %525 = arith.mulf %514, %524 : vector<2x32xf32>
    %526 = arith.addf %523, %525 : vector<2x32xf32>
    %527 = math.tanh %526 : vector<2x32xf32>
    %cst_131 = arith.constant 1.000000e+00 : f32
    %528 = vector.broadcast %cst_131 : f32 to vector<2x32xf32>
    %529 = arith.subf %528, %522 : vector<2x32xf32>
    %530 = arith.mulf %529, %527 : vector<2x32xf32>
    %531 = arith.mulf %522, %503 : vector<2x32xf32>
    %532 = arith.addf %530, %531 : vector<2x32xf32>
    %cst_132 = arith.constant dense<0.000000e+00> : vector<2x96xf32>
    %533 = tpu.matmul %532, %328, %cst_132 {dimension_numbers = #tpu.dot_dimension_numbers<[1], [0], [0], [1], [0, 0, 1, 1], [], []>} : vector<2x32xf32>, vector<32x96xf32>, vector<2x96xf32> -> vector<2x96xf32>
    %534 = vector.broadcast %329 : vector<1x96xf32> to vector<2x96xf32>
    %535 = arith.addf %533, %534 : vector<2x96xf32>
    %536 = vector.extract_strided_slice %327 {offsets = [0, 0], sizes = [2, 32], strides = [1, 1]} : vector<2x96xf32> to vector<2x32xf32>
    %537 = vector.extract_strided_slice %535 {offsets = [0, 0], sizes = [2, 32], strides = [1, 1]} : vector<2x96xf32> to vector<2x32xf32>
    %538 = arith.addf %536, %537 : vector<2x32xf32>
    %539 = arith.negf %538 : vector<2x32xf32>
    %540 = math.exp %539 : vector<2x32xf32>
    %cst_133 = arith.constant 1.000000e+00 : f32
    %541 = vector.broadcast %cst_133 : f32 to vector<2x32xf32>
    %542 = arith.addf %541, %540 : vector<2x32xf32>
    %543 = arith.divf %541, %542 : vector<2x32xf32>
    %544 = vector.extract_strided_slice %327 {offsets = [0, 32], sizes = [2, 32], strides = [1, 1]} : vector<2x96xf32> to vector<2x32xf32>
    %545 = vector.extract_strided_slice %535 {offsets = [0, 32], sizes = [2, 32], strides = [1, 1]} : vector<2x96xf32> to vector<2x32xf32>
    %546 = arith.addf %544, %545 : vector<2x32xf32>
    %547 = arith.negf %546 : vector<2x32xf32>
    %548 = math.exp %547 : vector<2x32xf32>
    %cst_134 = arith.constant 1.000000e+00 : f32
    %549 = vector.broadcast %cst_134 : f32 to vector<2x32xf32>
    %550 = arith.addf %549, %548 : vector<2x32xf32>
    %551 = arith.divf %549, %550 : vector<2x32xf32>
    %552 = vector.extract_strided_slice %327 {offsets = [0, 64], sizes = [2, 32], strides = [1, 1]} : vector<2x96xf32> to vector<2x32xf32>
    %553 = vector.extract_strided_slice %535 {offsets = [0, 64], sizes = [2, 32], strides = [1, 1]} : vector<2x96xf32> to vector<2x32xf32>
    %554 = arith.mulf %543, %553 : vector<2x32xf32>
    %555 = arith.addf %552, %554 : vector<2x32xf32>
    %556 = math.tanh %555 : vector<2x32xf32>
    %cst_135 = arith.constant 1.000000e+00 : f32
    %557 = vector.broadcast %cst_135 : f32 to vector<2x32xf32>
    %558 = arith.subf %557, %551 : vector<2x32xf32>
    %559 = arith.mulf %558, %556 : vector<2x32xf32>
    %560 = arith.mulf %551, %532 : vector<2x32xf32>
    %561 = arith.addf %559, %560 : vector<2x32xf32>
    %562 = tpu.concatenate %358, %387, %416, %445, %474, %503, %532, %561 in 0 : vector<2x32xf32>, vector<2x32xf32>, vector<2x32xf32>, vector<2x32xf32>, vector<2x32xf32>, vector<2x32xf32>, vector<2x32xf32>, vector<2x32xf32> -> vector<16x32xf32>
    %c0_136 = arith.constant 0 : index
    %c0_137 = arith.constant 0 : index
    %563 = vector.load %arg9[%c0_136, %c0_137] : memref<32x128xf32, #tpu.memory_space<vmem>>, vector<32x128xf32>
    %cst_138 = arith.constant dense<0.000000e+00> : vector<16x128xf32>
    %564 = tpu.matmul %562, %563, %cst_138 {dimension_numbers = #tpu.dot_dimension_numbers<[1], [0], [0], [1], [0, 0, 1, 1], [], []>} : vector<16x32xf32>, vector<32x128xf32>, vector<16x128xf32> -> vector<16x128xf32>
    %c0_139 = arith.constant 0 : index
    %c0_140 = arith.constant 0 : index
    %565 = vector.load %arg10[%c0_139, %c0_140] : memref<1x128xf32, #tpu.memory_space<vmem>>, vector<1x128xf32>
    %566 = vector.broadcast %565 : vector<1x128xf32> to vector<16x128xf32>
    %567 = arith.addf %564, %566 : vector<16x128xf32>
    %cst_141 = arith.constant dense<0xFF800000> : vector<16xf32>
    %568 = vector.multi_reduction <maximumf>, %567, %cst_141 [1] : vector<16x128xf32> to vector<16xf32>
    %569 = vector.shape_cast %568 : vector<16xf32> to vector<16x1xf32>
    %570 = vector.broadcast %569 : vector<16x1xf32> to vector<16x128xf32>
    %571 = arith.subf %567, %570 : vector<16x128xf32>
    %572 = math.exp %571 : vector<16x128xf32>
    %cst_142 = arith.constant dense<0.000000e+00> : vector<16xf32>
    %573 = vector.multi_reduction <add>, %572, %cst_142 [1] : vector<16x128xf32> to vector<16xf32>
    %574 = vector.shape_cast %573 : vector<16xf32> to vector<16x1xf32>
    %575 = math.log %574 : vector<16x1xf32>
    %576 = arith.addf %569, %575 : vector<16x1xf32>
    %577 = vector.broadcast %576 : vector<16x1xf32> to vector<16x128xf32>
    %578 = arith.subf %567, %577 : vector<16x128xf32>
    %c0_143 = arith.constant 0 : index
    %c0_144 = arith.constant 0 : index
    %579 = vector.load %arg11[%c0_143, %c0_144] : memref<16x128xf32, #tpu.memory_space<vmem>>, vector<16x128xf32>
    tpu.vector_store %arg11[%c0_143, %c0_144], %578 {strides = array<i32>} : memref<16x128xf32, #tpu.memory_space<vmem>>, vector<16x128xf32>,
    %cst_145 = arith.constant 1.000000e+00 : f32
    %580 = vector.broadcast %cst_145 : f32 to vector<2x64x32xf32>
    %c0_146 = arith.constant 0 : index
    %c0_147 = arith.constant 0 : index
    %c0_148 = arith.constant 0 : index
    %581 = vector.load %arg12[%c0_146, %c0_147, %c0_148] : memref<2x64x32xf32, #tpu.memory_space<vmem>>, vector<2x64x32xf32>
    tpu.vector_store %arg12[%c0_146, %c0_147, %c0_148], %580 {strides = array<i32>} : memref<2x64x32xf32, #tpu.memory_space<vmem>>, vector<2x64x32xf32>,
    return
  }
}

</mosaic_0001>

<bundles_post_ra>
// kernel: seq2seq_attn_forward.1
= control target key start
LH: loop header
LB: loop body
LE: loop exit
PB: predicated region body
PF: predicated region fallthrough
CT: control target
= control target key end

     0   :  { %v3157_v0 = vmov 0.0   ;;  %vm3158_vm0 = vmmov 0   ;;  %s3159_s30 = smov 64   ;;  %vm51_vm1 = vcmask 261120   ;;  %v3161_v20 = vmov 1.0   ;;  %s3909_s2 = inlined_call_operand.vmem [shape: f32[32,96], index: 2, kind: input, shape index: {}]   ;;  %s3910_s3 = inlined_call_operand.vmem [shape: f32[1,96], index: 3, kind: input, shape index: {}]   ;;  %s3911_s0 = inlined_call_operand.vmem [shape: f32[8,2,96], index: 0, kind: input, shape index: {}]   ;;  %s3912_s12 = inlined_call_operand.vmem [shape: f32[2,64,32], index: 12, kind: output, shape index: {1}]   ;;  %s3913_s4 = inlined_call_operand.vmem [shape: f32[32,32], index: 4, kind: input, shape index: {}]   ;;  %s3914_s5 = inlined_call_operand.vmem [shape: f32[32,96], index: 5, kind: input, shape index: {}]   ;;  %s3915_s1 = inlined_call_operand.vmem [shape: f32[8,2,32], index: 1, kind: input, shape index: {}]   ;;  %s3916_s7 = inlined_call_operand.vmem [shape: f32[32,96], index: 7, kind: input, shape index: {}]   ;;  %s3917_s6 = inlined_call_operand.vmem [shape: f32[1,96], index: 6, kind: input, shape index: {}]   ;;  %s3918_s8 = inlined_call_operand.vmem [shape: f32[1,96], index: 8, kind: input, shape index: {}]   ;;  %s3919_s9 = inlined_call_operand.vmem [shape: f32[32,128], index: 9, kind: input, shape index: {}]   ;;  %s3920_s10 = inlined_call_operand.vmem [shape: f32[1,128], index: 10, kind: input, shape index: {}]   ;;  %s3921_s11 = inlined_call_operand.vmem [shape: f32[16,128], index: 11, kind: output, shape index: {0}]  }
   0x1   :  { %2762 = vmatprep.subr.mxu0 %v3157_v0  ;;  %v3231_v1 = vld [vmem:[%s3909_s2 + $0x18] sm:$0xff]  ;;  %v3236_v2 = vld [vmem:[%s3909_s2 + $0x10] sm:$0xff]  ;;  %2770 = vmatprep.mubr.msk.f32.mxu0 %vm3158_vm0, %v3157_v0  ;;  %v3246_v3 = vld [vmem:[%s3909_s2 + $0x8] sm:$0xff]  ;;  %2547 = vst.msk [vmem:[%s3912_s12] sm:$0xff] %vm51_vm1, %v3161_v20  ;;  %vm2418_vm2 = vcmask 1041408   ;;  %vm2420_vm3 = vcmask 1043456  }
   0x2   :  { %2763 = vmatpush3.msra.mxu0 %v3231_v1  ;;  %2773 = vmatprep.subr.mxu1 %v3157_v0  ;;  %v3255_v4 = vld [vmem:[%s3909_s2] sm:$0xff]  ;;  %2548 = vst.msk [vmem:[%s3912_s12 + $0x8] sm:$0xff] %vm51_vm1, %v3161_v20  ;;  %2549 = vst.msk [vmem:[%s3912_s12 + $0x10] sm:$0xff] %vm51_vm1, %v3161_v20  ;;  %vm2422_vm4 = vcmask 1045504  }
   0x3   :  { %2764 = vmatprep.subr.mxu0 %v3157_v0  ;;  %2774 = vmatpush3.msra.mxu1 %v3231_v1  ;;  %v3283_v5 = vld [vmem:[%s3910_s3] ss:$0 sm:$0xff]  ;;  %s3160_s3 = smov 96   ;;  %2550 = vst.msk [vmem:[%s3912_s12 + $0x18] sm:$0xff] %vm51_vm1, %v3161_v20  ;;  %2551 = vst.msk [vmem:[%s3912_s12 + $0x20] sm:$0xff] %vm51_vm1, %v3161_v20 }
   0x4   :  { %2765 = vmatpush3.msra.mxu0 %v3236_v2  ;;  %2775 = vmatprep.subr.mxu1 %v3157_v0  ;;  %v125_v9 = vld [vmem:[%s3911_s0] sm:$0x3]  ;;  %2552 = vst.msk [vmem:[%s3912_s12 + $0x28] sm:$0xff] %vm51_vm1, %v3161_v20  ;;  %2553 = vst.msk [vmem:[%s3912_s12 + $0x30] sm:$0xff] %vm51_vm1, %v3161_v20  ;;  %v2574_v30 = vld [vmem:[%s3911_s0 + $0x2] sm:$0x3] }
   0x5   :  { %2766 = vmatprep.subr.mxu0 %v3157_v0  ;;  %2776 = vmatpush3.msra.mxu1 %v3236_v2  ;;  %2554 = vst.msk [vmem:[%s3912_s12 + $0x38] sm:$0xff] %vm51_vm1, %v3161_v20  ;;  %2555 = vst.msk [vmem:[%s3912_s12 + $0x40] sm:$0xff] %vm51_vm1, %v3161_v20  ;;  %v2577_v50 = vld [vmem:[%s3911_s0 + $0x4] sm:$0x3] }
   0x6   :  { %2767 = vmatpush3.msra.mxu0 %v3246_v3  ;;  %2777 = vmatprep.subr.mxu1 %v3157_v0  ;;  %2556 = vst.msk [vmem:[%s3912_s12 + $0x48] sm:$0xff] %vm51_vm1, %v3161_v20  ;;  %2557 = vst.msk [vmem:[%s3912_s12 + $0x50] sm:$0xff] %vm51_vm1, %v3161_v20 }
   0x7   :  { %2768 = vmatprep.subr.mxu0 %v3157_v0  ;;  %2778 = vmatpush3.msra.mxu1 %v3246_v3  ;;  %2558 = vst.msk [vmem:[%s3912_s12 + $0x58] sm:$0xff] %vm51_vm1, %v3161_v20  ;;  %2559 = vst.msk [vmem:[%s3912_s12 + $0x60] sm:$0xff] %vm51_vm1, %v3161_v20 }
   0x8   :  { %2769 = vmatpush3.msra.mxu0 %v3255_v4  ;;  %2779 = vmatprep.subr.mxu1 %v3157_v0  ;;  %2560 = vst.msk [vmem:[%s3912_s12 + $0x68] sm:$0xff] %vm51_vm1, %v3161_v20  ;;  %2561 = vst.msk [vmem:[%s3912_s12 + $0x70] sm:$0xff] %vm51_vm1, %v3161_v20 }
   0x9   :  { %2771 = vmatmul.mubr.f32.vlgmr.msra.gmra.mxu0 %v3157_v0  ;;  %2780 = vmatpush3.msra.mxu1 %v3255_v4  ;;  %2562 = vst.msk [vmem:[%s3912_s12 + $0x78] sm:$0xff] %vm51_vm1, %v3161_v20 }
   0xa   :  { %2781 = vmatprep.mubr.msk.f32.mxu1 %vm3158_vm0, %v3157_v0  ;;  %2784 = vmatprep.subr.mxu0 %v3157_v0 }
   0xb   :  { %2785 = vmatpush3.msra.mxu0 %v3231_v1  ;;  %2792 = vmatprep.mubr.msk.f32.mxu0 %vm3158_vm0, %v3157_v0 }
   0xc   :  { %2786 = vmatprep.subr.mxu0 %v3157_v0  ;;  %2795 = vmatprep.subr.mxu1 %v3157_v0 }
   0xd   :  { %2787 = vmatpush3.msra.mxu0 %v3236_v2 }
   0xe   :  { %2788 = vmatprep.subr.mxu0 %v3157_v0 }
   0xf   :  { %2789 = vmatpush3.msra.mxu0 %v3246_v3 }
  0x10   :  { %2790 = vmatprep.subr.mxu0 %v3157_v0 }
  0x11   :  { %2791 = vmatpush3.msra.mxu0 %v3255_v4 }
  0x12   :  { %2806 = vmatprep.subr.mxu0 %v3157_v0 }
  0xc9   :  { %v121_v6 = vpop.f32.mrf.mxu0 }
  0xca   :  { %v122_v7 = vadd.f32 %v3283_v5, %v121_v6 }
  0xcb   :  { %v2772_v8 = vpop.f32.mrf.mxu0 }
  0xcc   :  { %134 = vrot.lane.b32.xlu0 %v122_v7, %s3159_s30  ;;  %v126_v10 = vadd.f32 %v125_v9, %v122_v7 }
  0xce   :  { %v2572_v11 = vmul.f32 -1.442695, %v126_v10 }
  0xd0   :  { %3053 = vpow2.f32 %v2572_v11 }
  0xdd   :  { %v3054_v12 = vpop.eup %3053 }
  0xde   :  { %v130_v13 = vadd.f32 1.0, %v3054_v12  ;;  %v2580_v12 = vld [vmem:[%s3911_s0 + $0x6] sm:$0x3] }
  0xe0   :  { %3055 = vrcp.f32 %v130_v13 }
  0xed   :  { %v3056_v14 = vpop.eup %3055 }
  0xee   :  { %v144_v21 = vsub.f32 1.0, %v3056_v14  ;;  %v150_v23 = vmul.f32 0.0, %v3056_v14 }
 0x13e   :  { %v135_v15 = vpop.permute.xlu0 %134 }
 0x13f   :  { %v137_v16 = vmul.f32 %v3056_v14, %v135_v15 }
 0x141   :  { %139 = vrot.lane.b32.xlu0 %v137_v16, %s3159_s30 }
 0x1b3   :  { %v140_v17 = vpop.permute.xlu0 %139 }
 0x1b4   :  { %v142_v18 = vadd.f32 %v140_v17, %v125_v9 }
 0x1b6   :  { %3057 = vtanh.f32 %v142_v18 }
 0x1c3   :  { %v3058_v19 = vpop.eup %3057 }
 0x1c4   :  { %146 = vrot.lane.b32.xlu1 %v3058_v19, %s3160_s3 }
 0x236   :  { %v147_v22 = vpop.permute.xlu1 %146 }
 0x237   :  { %v149_v24 = vmul.f32 %v147_v22, %v144_v21 }
 0x239   :  { %v3356_v25 = vadd.f32 %v150_v23, %v149_v24 }
 0x23b   :  { %154 = vrot.lane.b32.xlu1 %v3356_v25, %s3160_s3 }
 0x2ad   :  { %v155_v26 = vpop.permute.xlu1 %154 }
 0x2ae   :  { %2782 = vmatmul.mubr.msk.f32.vlgmr.msra.gmra.mxu1 %vm51_vm1, %v155_v26 }
 0x2af   :  { %2796 = vmatpush3.msra.mxu1 %v3231_v1  ;;  %2803 = vmatprep.mubr.msk.f32.mxu1 %vm3158_vm0, %v3157_v0 }
 0x2b0   :  { %2797 = vmatprep.subr.mxu1 %v3157_v0 }
 0x2b1   :  { %2798 = vmatpush3.msra.mxu1 %v3236_v2 }
 0x2b2   :  { %2799 = vmatprep.subr.mxu1 %v3157_v0 }
 0x2b3   :  { %2800 = vmatpush3.msra.mxu1 %v3246_v3 }
 0x2b4   :  { %2801 = vmatprep.subr.mxu1 %v3157_v0 }
 0x2b5   :  { %2802 = vmatpush3.msra.mxu1 %v3255_v4 }
 0x2b6   :  { %2817 = vmatprep.subr.mxu1 %v3157_v0 }
 0x36e   :  { %v224_v27 = vpop.f32.mrf.mxu1 }
 0x36f   :  { %v225_v28 = vadd.f32 %v3283_v5, %v224_v27 }
 0x370   :  { %v2783_v29 = vpop.f32.mrf.mxu1 }
 0x371   :  { %238 = vrot.lane.b32.xlu0 %v225_v28, %s3159_s30  ;;  %v230_v31 = vadd.f32 %v2574_v30, %v225_v28 }
 0x373   :  { %v2575_v32 = vmul.f32 -1.442695, %v230_v31 }
 0x375   :  { %3059 = vpow2.f32 %v2575_v32 }
 0x382   :  { %v3060_v33 = vpop.eup %3059 }
 0x383   :  { %v234_v34 = vadd.f32 1.0, %v3060_v33  ;;  %v2583_v33 = vld [vmem:[%s3911_s0 + $0x8] sm:$0x3] }
 0x385   :  { %3061 = vrcp.f32 %v234_v34 }
 0x392   :  { %v3062_v35 = vpop.eup %3061 }
 0x393   :  { %v248_v41 = vsub.f32 1.0, %v3062_v35  ;;  %v254_v43 = vmul.f32 %v3062_v35, %v3356_v25 }
 0x3e3   :  { %v239_v36 = vpop.permute.xlu0 %238 }
 0x3e4   :  { %v241_v37 = vmul.f32 %v3062_v35, %v239_v36 }
 0x3e6   :  { %243 = vrot.lane.b32.xlu1 %v241_v37, %s3159_s30 }
 0x458   :  { %v244_v38 = vpop.permute.xlu1 %243 }
 0x459   :  { %v246_v39 = vadd.f32 %v2574_v30, %v244_v38 }
 0x45b   :  { %3063 = vtanh.f32 %v246_v39 }
 0x468   :  { %v3064_v40 = vpop.eup %3063 }
 0x469   :  { %250 = vrot.lane.b32.xlu0 %v3064_v40, %s3160_s3 }
 0x4db   :  { %v251_v42 = vpop.permute.xlu0 %250 }
 0x4dc   :  { %v253_v44 = vmul.f32 %v251_v42, %v248_v41 }
 0x4de   :  { %v3379_v45 = vadd.f32 %v254_v43, %v253_v44 }
 0x4e0   :  { %258 = vrot.lane.b32.xlu1 %v3379_v45, %s3160_s3 }
 0x552   :  { %v259_v46 = vpop.permute.xlu1 %258 }
 0x553   :  { %2793 = vmatmul.mubr.msk.f32.vlgmr.msra.gmra.mxu0 %vm51_vm1, %v259_v46 }
 0x554   :  { %2807 = vmatpush3.msra.mxu0 %v3231_v1  ;;  %2814 = vmatprep.mubr.msk.f32.mxu0 %vm3158_vm0, %v3157_v0 }
 0x555   :  { %2808 = vmatprep.subr.mxu0 %v3157_v0 }
 0x556   :  { %2809 = vmatpush3.msra.mxu0 %v3236_v2 }
 0x557   :  { %2810 = vmatprep.subr.mxu0 %v3157_v0 }
 0x558   :  { %2811 = vmatpush3.msra.mxu0 %v3246_v3 }
 0x559   :  { %2812 = vmatprep.subr.mxu0 %v3157_v0 }
 0x55a   :  { %2813 = vmatpush3.msra.mxu0 %v3255_v4 }
 0x55b   :  { %2828 = vmatprep.subr.mxu0 %v3157_v0 }
 0x613   :  { %v328_v47 = vpop.f32.mrf.mxu0 }
 0x614   :  { %v329_v48 = vadd.f32 %v3283_v5, %v328_v47 }
 0x615   :  { %v2794_v49 = vpop.f32.mrf.mxu0 }
 0x616   :  { %342 = vrot.lane.b32.xlu0 %v329_v48, %s3159_s30  ;;  %v334_v51 = vadd.f32 %v2577_v50, %v329_v48 }
 0x618   :  { %v2578_v52 = vmul.f32 -1.442695, %v334_v51 }
 0x61a   :  { %3065 = vpow2.f32 %v2578_v52 }
 0x627   :  { %v3066_v53 = vpop.eup %3065 }
 0x628   :  { %v338_v54 = vadd.f32 1.0, %v3066_v53 }
 0x62a   :  { %3067 = vrcp.f32 %v338_v54 }
 0x637   :  { %v3068_v55 = vpop.eup %3067 }
 0x638   :  { %v352_v61 = vsub.f32 1.0, %v3068_v55  ;;  %v358_v63 = vmul.f32 %v3068_v55, %v3379_v45 }
 0x688   :  { %v343_v56 = vpop.permute.xlu0 %342 }
 0x689   :  { %v345_v57 = vmul.f32 %v3068_v55, %v343_v56 }
 0x68b   :  { %347 = vrot.lane.b32.xlu1 %v345_v57, %s3159_s30 }
 0x6fd   :  { %v348_v58 = vpop.permute.xlu1 %347 }
 0x6fe   :  { %v350_v59 = vadd.f32 %v2577_v50, %v348_v58 }
 0x700   :  { %3069 = vtanh.f32 %v350_v59 }
 0x70d   :  { %v3070_v60 = vpop.eup %3069 }
 0x70e   :  { %354 = vrot.lane.b32.xlu0 %v3070_v60, %s3160_s3 }
 0x780   :  { %v355_v62 = vpop.permute.xlu0 %354 }
 0x781   :  { %v357_v6 = vmul.f32 %v355_v62, %v352_v61 }
 0x783   :  { %v3402_v7 = vadd.f32 %v358_v63, %v357_v6 }
 0x785   :  { %362 = vrot.lane.b32.xlu1 %v3402_v7, %s3160_s3 }
 0x7f7   :  { %v363_v8 = vpop.permute.xlu1 %362 }
 0x7f8   :  { %2804 = vmatmul.mubr.msk.f32.vlgmr.msra.gmra.mxu1 %vm51_vm1, %v363_v8 }
 0x7f9   :  { %2818 = vmatpush3.msra.mxu1 %v3231_v1  ;;  %2825 = vmatprep.mubr.msk.f32.mxu1 %vm3158_vm0, %v3157_v0 }
 0x7fa   :  { %2819 = vmatprep.subr.mxu1 %v3157_v0 }
 0x7fb   :  { %2820 = vmatpush3.msra.mxu1 %v3236_v2 }
 0x7fc   :  { %2821 = vmatprep.subr.mxu1 %v3157_v0 }
 0x7fd   :  { %2822 = vmatpush3.msra.mxu1 %v3246_v3 }
 0x7fe   :  { %2823 = vmatprep.subr.mxu1 %v3157_v0 }
 0x7ff   :  { %2824 = vmatpush3.msra.mxu1 %v3255_v4 }
 0x800   :  { %2839 = vmatprep.subr.mxu1 %v3157_v0 }
 0x8b8   :  { %v432_v9 = vpop.f32.mrf.mxu1 }
 0x8b9   :  { %v433_v10 = vadd.f32 %v3283_v5, %v432_v9 }
 0x8ba   :  { %v2805_v11 = vpop.f32.mrf.mxu1 }
 0x8bb   :  { %446 = vrot.lane.b32.xlu0 %v433_v10, %s3159_s30  ;;  %v438_v13 = vadd.f32 %v2580_v12, %v433_v10 }
 0x8bd   :  { %v2581_v14 = vmul.f32 -1.442695, %v438_v13  ;;  %v2589_v13 = vld [vmem:[%s3911_s0 + $0xc] sm:$0x3] }
 0x8bf   :  { %3071 = vpow2.f32 %v2581_v14 }
 0x8cc   :  { %v3072_v15 = vpop.eup %3071 }
 0x8cd   :  { %v442_v16 = vadd.f32 1.0, %v3072_v15 }
 0x8cf   :  { %3073 = vrcp.f32 %v442_v16 }
 0x8dc   :  { %v3074_v17 = vpop.eup %3073 }
 0x8dd   :  { %v456_v23 = vsub.f32 1.0, %v3074_v17  ;;  %v462_v26 = vmul.f32 %v3074_v17, %v3402_v7 }
 0x92d   :  { %v447_v18 = vpop.permute.xlu0 %446 }
 0x92e   :  { %v449_v19 = vmul.f32 %v3074_v17, %v447_v18 }
 0x930   :  { %451 = vrot.lane.b32.xlu1 %v449_v19, %s3159_s30 }
 0x9a2   :  { %v452_v20 = vpop.permute.xlu1 %451 }
 0x9a3   :  { %v454_v21 = vadd.f32 %v2580_v12, %v452_v20 }
 0x9a5   :  { %3075 = vtanh.f32 %v454_v21 }
 0x9b2   :  { %v3076_v22 = vpop.eup %3075 }
 0x9b3   :  { %458 = vrot.lane.b32.xlu0 %v3076_v22, %s3160_s3 }
 0xa25   :  { %v459_v24 = vpop.permute.xlu0 %458 }
 0xa26   :  { %v461_v27 = vmul.f32 %v459_v24, %v456_v23 }
 0xa28   :  { %v3425_v28 = vadd.f32 %v462_v26, %v461_v27 }
 0xa2a   :  { %466 = vrot.lane.b32.xlu1 %v3425_v28, %s3160_s3 }
 0xa9c   :  { %v467_v29 = vpop.permute.xlu1 %466 }
 0xa9d   :  { %2815 = vmatmul.mubr.msk.f32.vlgmr.msra.gmra.mxu0 %vm51_vm1, %v467_v29 }
 0xa9e   :  { %2829 = vmatpush3.msra.mxu0 %v3231_v1  ;;  %2836 = vmatprep.mubr.msk.f32.mxu0 %vm3158_vm0, %v3157_v0 }
 0xa9f   :  { %2830 = vmatprep.subr.mxu0 %v3157_v0 }
 0xaa0   :  { %2831 = vmatpush3.msra.mxu0 %v3236_v2 }
 0xaa1   :  { %2832 = vmatprep.subr.mxu0 %v3157_v0 }
 0xaa2   :  { %2833 = vmatpush3.msra.mxu0 %v3246_v3 }
 0xaa3   :  { %2834 = vmatprep.subr.mxu0 %v3157_v0 }
 0xaa4   :  { %2835 = vmatpush3.msra.mxu0 %v3255_v4 }
 0xaa5   :  { %2850 = vmatprep.subr.mxu0 %v3157_v0 }
 0xb5d   :  { %v536_v30 = vpop.f32.mrf.mxu0 }
 0xb5e   :  { %v537_v31 = vadd.f32 %v3283_v5, %v536_v30 }
 0xb5f   :  { %v2816_v32 = vpop.f32.mrf.mxu0 }
 0xb60   :  { %550 = vrot.lane.b32.xlu0 %v537_v31, %s3159_s30  ;;  %v542_v34 = vadd.f32 %v2583_v33, %v537_v31 }
 0xb62   :  { %v2584_v35 = vmul.f32 -1.442695, %v542_v34 }
 0xb64   :  { %3077 = vpow2.f32 %v2584_v35  ;;  %v2592_v35 = vld [vmem:[%s3911_s0 + $0xe] sm:$0x3] }
 0xb71   :  { %v3078_v36 = vpop.eup %3077 }
 0xb72   :  { %v546_v37 = vadd.f32 1.0, %v3078_v36 }
 0xb74   :  { %3079 = vrcp.f32 %v546_v37 }
 0xb81   :  { %v3080_v38 = vpop.eup %3079 }
 0xb82   :  { %v560_v44 = vsub.f32 1.0, %v3080_v38  ;;  %v566_v47 = vmul.f32 %v3080_v38, %v3425_v28 }
 0xbd2   :  { %v551_v39 = vpop.permute.xlu0 %550 }
 0xbd3   :  { %v553_v40 = vmul.f32 %v3080_v38, %v551_v39 }
 0xbd5   :  { %555 = vrot.lane.b32.xlu1 %v553_v40, %s3159_s30 }
 0xc47   :  { %v556_v41 = vpop.permute.xlu1 %555 }
 0xc48   :  { %v558_v42 = vadd.f32 %v2583_v33, %v556_v41 }
 0xc4a   :  { %3081 = vtanh.f32 %v558_v42 }
 0xc57   :  { %v3082_v43 = vpop.eup %3081 }
 0xc58   :  { %562 = vrot.lane.b32.xlu0 %v3082_v43, %s3160_s3 }
 0xcca   :  { %v563_v46 = vpop.permute.xlu0 %562 }
 0xccb   :  { %v565_v48 = vmul.f32 %v563_v46, %v560_v44  ;;  %v884_v44 = vld [vmem:[%s3913_s4 + $0x18] sm:$0xff]  ;;  %v883_v46 = vld [vmem:[%s3913_s4 + $0x10] sm:$0xff] }
 0xccd   :  { %v3448_v49 = vadd.f32 %v566_v47, %v565_v48  ;;  %v882_v47 = vld [vmem:[%s3913_s4 + $0x8] sm:$0xff] }
 0xccf   :  { %570 = vrot.lane.b32.xlu1 %v3448_v49, %s3160_s3 }
 0xd41   :  { %v571_v50 = vpop.permute.xlu1 %570 }
 0xd42   :  { %2826 = vmatmul.mubr.msk.f32.vlgmr.msra.gmra.mxu1 %vm51_vm1, %v571_v50  ;;  %v881_v50 = vld [vmem:[%s3913_s4] sm:$0xff] }
 0xd43   :  { %2840 = vmatpush3.msra.mxu1 %v3231_v1  ;;  %2847 = vmatprep.mubr.msk.f32.mxu1 %vm3158_vm0, %v3157_v0 }
 0xd44   :  { %2841 = vmatprep.subr.mxu1 %v3157_v0 }
 0xd45   :  { %2842 = vmatpush3.msra.mxu1 %v3236_v2  ;;  %v2586_v2 = vld [vmem:[%s3911_s0 + $0xa] sm:$0x3] }
 0xd46   :  { %2843 = vmatprep.subr.mxu1 %v3157_v0 }
 0xd47   :  { %2844 = vmatpush3.msra.mxu1 %v3246_v3 }
 0xd48   :  { %2845 = vmatprep.subr.mxu1 %v3157_v0 }
 0xd49   :  { %2846 = vmatpush3.msra.mxu1 %v3255_v4 }
 0xd4a   :  { %2861 = vmatprep.subr.mxu1 %v3157_v0 }
 0xe02   :  { %v640_v51 = vpop.f32.mrf.mxu1 }
 0xe03   :  { %v641_v1 = vadd.f32 %v3283_v5, %v640_v51  ;;  %v256_v51 = vadd.f32 %v3379_v45, %v3356_v25 }
 0xe04   :  { %v2827_v52 = vpop.f32.mrf.mxu1 }
 0xe05   :  { %654 = vrot.lane.b32.xlu0 %v641_v1, %s3159_s30  ;;  %v646_v53 = vadd.f32 %v2586_v2, %v641_v1  ;;  %v360_v1 = vadd.f32 %v3402_v7, %v256_v51  ;;  %v3519_v52 = vld [vmem:[%s3914_s5 + $0x18] sm:$0xff] }
 0xe07   :  { %v2587_v54 = vmul.f32 -1.442695, %v646_v53  ;;  %v464_v53 = vadd.f32 %v3425_v28, %v360_v1 }
 0xe09   :  { %3083 = vpow2.f32 %v2587_v54  ;;  %v568_v25 = vadd.f32 %v3448_v49, %v464_v53 }
 0xe16   :  { %v3084_v3 = vpop.eup %3083 }
 0xe17   :  { %v650_v55 = vadd.f32 1.0, %v3084_v3 }
 0xe19   :  { %3085 = vrcp.f32 %v650_v55 }
 0xe26   :  { %v3086_v56 = vpop.eup %3085 }
 0xe27   :  { %v664_v61 = vsub.f32 1.0, %v3086_v56  ;;  %v670_v63 = vmul.f32 %v3086_v56, %v3448_v49  ;;  %v3549_v49 = vld [vmem:[%s3914_s5 + $0x8] sm:$0xff] }
 0xe77   :  { %v655_v4 = vpop.permute.xlu0 %654 }
 0xe78   :  { %v657_v57 = vmul.f32 %v3086_v56, %v655_v4 }
 0xe7a   :  { %659 = vrot.lane.b32.xlu1 %v657_v57, %s3159_s30 }
 0xeec   :  { %v660_v58 = vpop.permute.xlu1 %659 }
 0xeed   :  { %v662_v59 = vadd.f32 %v2586_v2, %v660_v58  ;;  %v3525_v2 = vld [vmem:[%s3914_s5 + $0x10] sm:$0xff]  ;;  %v3558_v58 = vld [vmem:[%s3914_s5] sm:$0xff] }
 0xeef   :  { %3087 = vtanh.f32 %v662_v59  ;;  %v965_v59 = vld [vmem:[%s3915_s1] sm:$0x3] }
 0xefc   :  { %v3088_v60 = vpop.eup %3087 }
 0xefd   :  { %666 = vrot.lane.b32.xlu0 %v3088_v60, %s3160_s3  ;;  %v2597_v60 = vld [vmem:[%s3915_s1 + $0x2] sm:$0x3] }
 0xf6f   :  { %v667_v62 = vpop.permute.xlu0 %666 }
 0xf70   :  { %v669_v6 = vmul.f32 %v667_v62, %v664_v61 }
 0xf72   :  { %v3471_v8 = vadd.f32 %v670_v63, %v669_v6 }
 0xf74   :  { %674 = vrot.lane.b32.xlu1 %v3471_v8, %s3160_s3  ;;  %v672_v54 = vadd.f32 %v3471_v8, %v568_v25 }
 0xfe6   :  { %v675_v9 = vpop.permute.xlu1 %674 }
 0xfe7   :  { %2837 = vmatmul.mubr.msk.f32.vlgmr.msra.gmra.mxu0 %vm51_vm1, %v675_v9 }
 0xfe8   :  { %2858 = vmatprep.mubr.msk.f32.mxu0 %vm3158_vm0, %v3157_v0  ;;  %2851 = vmatpush3.msra.mxu0 %v884_v44 }
 0xfe9   :  { %2852 = vmatprep.subr.mxu0 %v3157_v0 }
 0xfea   :  { %2853 = vmatpush3.msra.mxu0 %v883_v46 }
 0xfeb   :  { %2854 = vmatprep.subr.mxu0 %v3157_v0 }
 0xfec   :  { %2855 = vmatpush3.msra.mxu0 %v882_v47 }
 0xfed   :  { %2856 = vmatprep.subr.mxu0 %v3157_v0 }
 0xfee   :  { %2857 = vmatpush3.msra.mxu0 %v881_v50 }
 0xfef   :  { %2872 = vmatprep.subr.mxu0 %v3157_v0 }
0x10a7   :  { %v744_v10 = vpop.f32.mrf.mxu0 }
0x10a8   :  { %v745_v11 = vadd.f32 %v3283_v5, %v744_v10  ;;  %v2599_v10 = vld [vmem:[%s3915_s1 + $0x4] sm:$0x3] }
0x10a9   :  { %v2838_v12 = vpop.f32.mrf.mxu0 }
0x10aa   :  { %758 = vrot.lane.b32.xlu0 %v745_v11, %s3159_s30  ;;  %v750_v14 = vadd.f32 %v2589_v13, %v745_v11  ;;  %v2601_v11 = vld [vmem:[%s3915_s1 + $0x6] sm:$0x3] }
0x10ac   :  { %v2590_v15 = vmul.f32 -1.442695, %v750_v14 }
0x10ae   :  { %3089 = vpow2.f32 %v2590_v15 }
0x10bb   :  { %v3090_v16 = vpop.eup %3089 }
0x10bc   :  { %v754_v17 = vadd.f32 1.0, %v3090_v16  ;;  %v2603_v16 = vld [vmem:[%s3915_s1 + $0x8] sm:$0x3] }
0x10be   :  { %3091 = vrcp.f32 %v754_v17  ;;  %v2605_v17 = vld [vmem:[%s3915_s1 + $0xa] sm:$0x3] }
0x10cb   :  { %v3092_v18 = vpop.eup %3091 }
0x10cc   :  { %v768_v24 = vsub.f32 1.0, %v3092_v18  ;;  %v774_v27 = vmul.f32 %v3092_v18, %v3471_v8 }
0x111c   :  { %v759_v19 = vpop.permute.xlu0 %758 }
0x111d   :  { %v761_v20 = vmul.f32 %v3092_v18, %v759_v19 }
0x111f   :  { %763 = vrot.lane.b32.xlu1 %v761_v20, %s3159_s30 }
0x1191   :  { %v764_v21 = vpop.permute.xlu1 %763 }
0x1192   :  { %v766_v22 = vadd.f32 %v2589_v13, %v764_v21 }
0x1194   :  { %3093 = vtanh.f32 %v766_v22  ;;  %v2607_v22 = vld [vmem:[%s3915_s1 + $0xc] sm:$0x3] }
0x11a1   :  { %v3094_v23 = vpop.eup %3093 }
0x11a2   :  { %770 = vrot.lane.b32.xlu0 %v3094_v23, %s3160_s3  ;;  %v2609_v23 = vld [vmem:[%s3915_s1 + $0xe] sm:$0x3] }
0x1214   :  { %v771_v26 = vpop.permute.xlu0 %770 }
0x1215   :  { %v773_v29 = vmul.f32 %v771_v26, %v768_v24 }
0x1217   :  { %v775_v30 = vadd.f32 %v774_v27, %v773_v29 }
0x1219   :  { %778 = vrot.lane.b32.xlu1 %v775_v30, %s3160_s3  ;;  %v776_v4 = vadd.f32 %v775_v30, %v672_v54 }
0x128b   :  { %v779_v31 = vpop.permute.xlu1 %778 }
0x128c   :  { %2848 = vmatmul.mubr.msk.f32.vlgmr.msra.gmra.mxu1 %vm51_vm1, %v779_v31  ;;  %v3673_v31 = vld [vmem:[%s3916_s7 + $0x10] sm:$0xff] }
0x128d   :  { %2869 = vmatprep.mubr.msk.f32.mxu1 %vm3158_vm0, %v3157_v0  ;;  %2862 = vmatpush3.msra.mxu1 %v3519_v52 }
0x128e   :  { %2863 = vmatprep.subr.mxu1 %v3157_v0 }
0x128f   :  { %2864 = vmatpush3.msra.mxu1 %v3525_v2 }
0x1290   :  { %2865 = vmatprep.subr.mxu1 %v3157_v0 }
0x1291   :  { %2866 = vmatpush3.msra.mxu1 %v3549_v49 }
0x1292   :  { %2867 = vmatprep.subr.mxu1 %v3157_v0 }
0x1293   :  { %2868 = vmatpush3.msra.mxu1 %v3558_v58 }
0x1294   :  { %2883 = vmatprep.subr.mxu1 %v3157_v0 }
0x134c   :  { %v848_v32 = vpop.f32.mrf.mxu1 }
0x134d   :  { %v849_v33 = vadd.f32 %v3283_v5, %v848_v32  ;;  %v3683_v32 = vld [vmem:[%s3916_s7 + $0x8] sm:$0xff] }
0x134e   :  { %v2849_v34 = vpop.f32.mrf.mxu1 }
0x134f   :  { %862 = vrot.lane.b32.xlu0 %v849_v33, %s3159_s30  ;;  %v854_v36 = vadd.f32 %v2592_v35, %v849_v33  ;;  %v3692_v33 = vld [vmem:[%s3916_s7] sm:$0xff] }
0x1351   :  { %v2593_v37 = vmul.f32 -1.442695, %v854_v36 }
0x1353   :  { %3095 = vpow2.f32 %v2593_v37 }
0x1360   :  { %v3096_v38 = vpop.eup %3095 }
0x1361   :  { %v858_v39 = vadd.f32 1.0, %v3096_v38 }
0x1363   :  { %3097 = vrcp.f32 %v858_v39 }
0x1370   :  { %v3098_v40 = vpop.eup %3097 }
0x1371   :  { %v872_v45 = vsub.f32 1.0, %v3098_v40  ;;  %v878_v3 = vmul.f32 %v3098_v40, %v775_v30  ;;  %v3665_v30 = vld [vmem:[%s3916_s7 + $0x18] sm:$0xff] }
0x13c1   :  { %v863_v41 = vpop.permute.xlu0 %862 }
0x13c2   :  { %v865_v42 = vmul.f32 %v3098_v40, %v863_v41 }
0x13c4   :  { %867 = vrot.lane.b32.xlu1 %v865_v42, %s3159_s30 }
0x1436   :  { %v868_v43 = vpop.permute.xlu1 %867 }
0x1437   :  { %v870_v5 = vadd.f32 %v2592_v35, %v868_v43  ;;  %v2595_v35 = vld [vmem:[%s3917_s6] ss:$0 sm:$0xff] }
0x1439   :  { %3099 = vtanh.f32 %v870_v5 }
0x1446   :  { %v3100_v48 = vpop.eup %3099 }
0x1447   :  { %874 = vrot.lane.b32.xlu0 %v3100_v48, %s3160_s3 }
0x14b9   :  { %v875_v7 = vpop.permute.xlu0 %874 }
0x14ba   :  { %v877_v55 = vmul.f32 %v875_v7, %v872_v45 }
0x14bc   :  { %v3533_v56 = vadd.f32 %v878_v3, %v877_v55  ;;  %v3737_v3 = vld [vmem:[%s3918_s8] ss:$0 sm:$0xff] }
0x14be   :  { %1598 = vrot.lane.b32.xlu0 %v3533_v56, %s3160_s3  ;;  %v880_v28 = vadd.f32 %v3533_v56, %v776_v4 }
0x14c0   :  { %886 = vrot.lane.b32.xlu1 %v880_v28, %s3160_s3 }
0x1530   :  { %v1599_v34 = vpop.permute.xlu0 %1598 }
0x1532   :  { %v887_v57 = vpop.permute.xlu1 %886 }
0x1533   :  { %2859 = vmatmul.mubr.msk.f32.vlgmr.msra.gmra.mxu0 %vm51_vm1, %v887_v57 }
0x1534   :  { %2873 = vmatpush3.msra.mxu0 %v3519_v52  ;;  %2880 = vmatprep.mubr.msk.f32.mxu0 %vm3158_vm0, %v3157_v0 }
0x1535   :  { %2874 = vmatprep.subr.mxu0 %v3157_v0 }
0x1536   :  { %2875 = vmatpush3.msra.mxu0 %v3525_v2 }
0x1537   :  { %2876 = vmatprep.subr.mxu0 %v3157_v0 }
0x1538   :  { %2877 = vmatpush3.msra.mxu0 %v3549_v49 }
0x1539   :  { %2878 = vmatprep.subr.mxu0 %v3157_v0 }
0x153a   :  { %2879 = vmatpush3.msra.mxu0 %v3558_v58 }
0x153b   :  { %2894 = vmatprep.subr.mxu0 %v3157_v0 }
0x15f3   :  { %v3570_v61 = vpop.f32.mrf.mxu0 }
0x15f4   :  { %v966_v62 = vadd.f32 %v965_v59, %v3570_v61  ;;  %v1049_v63 = vadd.f32 %v2597_v60, %v3570_v61  ;;  %v1126_v12 = vadd.f32 %v2599_v10, %v3570_v61  ;;  %v1203_v13 = vadd.f32 %v2601_v11, %v3570_v61 }
0x15f5   :  { %v2860_v6 = vpop.f32.mrf.mxu0  ;;  %v1280_v18 = vadd.f32 %v2603_v16, %v3570_v61  ;;  %v1357_v19 = vadd.f32 %v2605_v17, %v3570_v61  ;;  %v1434_v24 = vadd.f32 %v2607_v22, %v3570_v61  ;;  %v1511_v26 = vadd.f32 %v2609_v23, %v3570_v61 }
0x15f6   :  { %v967_v8 = vmax.f32 %v966_v62, 0.0  ;;  %v1050_v9 = vmax.f32 %v1049_v63, 0.0  ;;  %v1127_v14 = vmax.f32 %v1126_v12, 0.0  ;;  %v1204_v15 = vmax.f32 %v1203_v13, 0.0 }
0x15f7   :  { %v1281_v20 = vmax.f32 %v1280_v18, 0.0  ;;  %v1358_v21 = vmax.f32 %v1357_v19, 0.0  ;;  %v1435_v27 = vmax.f32 %v1434_v24, 0.0  ;;  %v1512_v29 = vmax.f32 %v1511_v26, 0.0 }
0x15f8   :  { %2870 = vmatmul.mubr.msk.f32.vlgmr.msra.gmra.mxu1 %vm51_vm1, %v967_v8  ;;  %2881 = vmatmul.mubr.msk.f32.vlgmr.msra.gmra.mxu0 %vm51_vm1, %v1050_v9 }
0x15f9   :  { %2884 = vmatpush3.msra.mxu1 %v3519_v52  ;;  %2895 = vmatpush3.msra.mxu0 %v3519_v52 }
0x15fa   :  { %2885 = vmatprep.subr.mxu1 %v3157_v0  ;;  %2896 = vmatprep.subr.mxu0 %v3157_v0 }
0x15fb   :  { %2886 = vmatpush3.msra.mxu1 %v3525_v2  ;;  %2897 = vmatpush3.msra.mxu0 %v3525_v2 }
0x15fc   :  { %2887 = vmatprep.subr.mxu1 %v3157_v0  ;;  %2898 = vmatprep.subr.mxu0 %v3157_v0 }
0x15fd   :  { %2888 = vmatpush3.msra.mxu1 %v3549_v49  ;;  %2899 = vmatpush3.msra.mxu0 %v3549_v49 }
0x15fe   :  { %2889 = vmatprep.subr.mxu1 %v3157_v0  ;;  %2900 = vmatprep.subr.mxu0 %v3157_v0 }
0x15ff   :  { %2890 = vmatpush3.msra.mxu1 %v3558_v58  ;;  %2891 = vmatprep.mubr.msk.f32.mxu1 %vm3158_vm0, %v3157_v0 }
0x1600   :  { %2901 = vmatpush3.msra.mxu0 %v3558_v58  ;;  %2902 = vmatprep.mubr.msk.f32.mxu0 %vm3158_vm0, %v3157_v0 }
0x1601   :  { %2892 = vmatmul.mubr.msk.f32.vlgmr.msra.gmra.mxu1 %vm51_vm1, %v1127_v14  ;;  %2903 = vmatmul.mubr.msk.f32.vlgmr.msra.gmra.mxu0 %vm51_vm1, %v1204_v15 }
0x1602   :  { %2905 = vmatprep.subr.mxu1 %v3157_v0  ;;  %2916 = vmatprep.subr.mxu0 %v3157_v0 }
0x1603   :  { %2906 = vmatpush3.msra.mxu1 %v3519_v52  ;;  %2917 = vmatpush3.msra.mxu0 %v3519_v52 }
0x1604   :  { %2907 = vmatprep.subr.mxu1 %v3157_v0  ;;  %2918 = vmatprep.subr.mxu0 %v3157_v0 }
0x1605   :  { %2908 = vmatpush3.msra.mxu1 %v3525_v2  ;;  %2919 = vmatpush3.msra.mxu0 %v3525_v2 }
0x1606   :  { %2909 = vmatprep.subr.mxu1 %v3157_v0  ;;  %2920 = vmatprep.subr.mxu0 %v3157_v0 }
0x1607   :  { %2910 = vmatpush3.msra.mxu1 %v3549_v49  ;;  %2921 = vmatpush3.msra.mxu0 %v3549_v49 }
0x1608   :  { %2911 = vmatprep.subr.mxu1 %v3157_v0  ;;  %2922 = vmatprep.subr.mxu0 %v3157_v0 }
0x1609   :  { %2912 = vmatpush3.msra.mxu1 %v3558_v58  ;;  %2913 = vmatprep.mubr.msk.f32.mxu1 %vm3158_vm0, %v3157_v0 }
0x160a   :  { %2923 = vmatpush3.msra.mxu0 %v3558_v58  ;;  %2924 = vmatprep.mubr.msk.f32.mxu0 %vm3158_vm0, %v3157_v0 }
0x160b   :  { %2914 = vmatmul.mubr.msk.f32.vlgmr.msra.gmra.mxu1 %vm51_vm1, %v1281_v20  ;;  %2925 = vmatmul.mubr.msk.f32.vlgmr.msra.gmra.mxu0 %vm51_vm1, %v1358_v21 }
0x160c   :  { %2927 = vmatprep.subr.mxu1 %v3157_v0  ;;  %2938 = vmatprep.subr.mxu0 %v3157_v0 }
0x160d   :  { %2928 = vmatpush3.msra.mxu1 %v3519_v52  ;;  %2939 = vmatpush3.msra.mxu0 %v3519_v52 }
0x160e   :  { %2929 = vmatprep.subr.mxu1 %v3157_v0  ;;  %2940 = vmatprep.subr.mxu0 %v3157_v0 }
0x160f   :  { %2930 = vmatpush3.msra.mxu1 %v3525_v2  ;;  %2941 = vmatpush3.msra.mxu0 %v3525_v2 }
0x1610   :  { %2931 = vmatprep.subr.mxu1 %v3157_v0  ;;  %2942 = vmatprep.subr.mxu0 %v3157_v0 }
0x1611   :  { %2932 = vmatpush3.msra.mxu1 %v3549_v49  ;;  %2943 = vmatpush3.msra.mxu0 %v3549_v49 }
0x1612   :  { %2933 = vmatprep.subr.mxu1 %v3157_v0  ;;  %2944 = vmatprep.subr.mxu0 %v3157_v0 }
0x1613   :  { %2934 = vmatpush3.msra.mxu1 %v3558_v58  ;;  %2935 = vmatprep.mubr.msk.f32.mxu1 %vm3158_vm0, %v3157_v0 }
0x1614   :  { %2945 = vmatpush3.msra.mxu0 %v3558_v58  ;;  %2946 = vmatprep.mubr.msk.f32.mxu0 %vm3158_vm0, %v3157_v0 }
0x1615   :  { %2936 = vmatmul.mubr.msk.f32.vlgmr.msra.gmra.mxu1 %vm51_vm1, %v1435_v27  ;;  %2947 = vmatmul.mubr.msk.f32.vlgmr.msra.gmra.mxu0 %vm51_vm1, %v1512_v29 }
0x1616   :  { %2949 = vmatprep.subr.mxu1 %v3157_v0  ;;  %2957 = vmatprep.mubr.msk.f32.mxu1 %vm3158_vm0, %v3157_v0 }
0x1617   :  { %2950 = vmatpush3.msra.mxu1 %v3665_v30  ;;  %2960 = vmatprep.subr.mxu0 %v3157_v0 }
0x1618   :  { %2951 = vmatprep.subr.mxu1 %v3157_v0  ;;  %2961 = vmatpush3.msra.mxu0 %v3665_v30 }
0x1619   :  { %2952 = vmatpush3.msra.mxu1 %v3673_v31  ;;  %2962 = vmatprep.subr.mxu0 %v3157_v0 }
0x161a   :  { %2953 = vmatprep.subr.mxu1 %v3157_v0  ;;  %2963 = vmatpush3.msra.mxu0 %v3673_v31 }
0x161b   :  { %2954 = vmatpush3.msra.mxu1 %v3683_v32  ;;  %2964 = vmatprep.subr.mxu0 %v3157_v0 }
0x161c   :  { %2955 = vmatprep.subr.mxu1 %v3157_v0  ;;  %2965 = vmatpush3.msra.mxu0 %v3683_v32 }
0x161d   :  { %2956 = vmatpush3.msra.mxu1 %v3692_v33  ;;  %2966 = vmatprep.subr.mxu0 %v3157_v0 }
0x161e   :  { %2958 = vmatmul.mubr.msk.f32.vlgmr.msra.gmra.mxu1 %vm51_vm1, %v1599_v34  ;;  %2967 = vmatpush3.msra.mxu0 %v3692_v33 }
0x161f   :  { %2968 = vmatprep.mubr.msk.f32.mxu0 %vm3158_vm0, %v3157_v0  ;;  %2971 = vmatprep.subr.mxu1 %v3157_v0 }
0x1620   :  { %2972 = vmatpush3.msra.mxu1 %v3665_v30  ;;  %2979 = vmatprep.mubr.msk.f32.mxu1 %vm3158_vm0, %v3157_v0 }
0x1621   :  { %2973 = vmatprep.subr.mxu1 %v3157_v0  ;;  %2982 = vmatprep.subr.mxu0 %v3157_v0 }
0x1622   :  { %2974 = vmatpush3.msra.mxu1 %v3673_v31 }
0x1623   :  { %2975 = vmatprep.subr.mxu1 %v3157_v0 }
0x1624   :  { %2976 = vmatpush3.msra.mxu1 %v3683_v32 }
0x1625   :  { %2977 = vmatprep.subr.mxu1 %v3157_v0 }
0x1626   :  { %2978 = vmatpush3.msra.mxu1 %v3692_v33 }
0x1627   :  { %2993 = vmatprep.subr.mxu1 %v3157_v0 }
0x16b8   :  { %v1043_v36 = vpop.f32.mrf.mxu1  ;;  %v1120_v37 = vpop.f32.mrf.mxu0 }
0x16b9   :  { %v3720_v38 = vadd.f32 %v2595_v35, %v1120_v37  ;;  %v1044_v57 = vadd.f32 %v2595_v35, %v1043_v36 }
0x16ba   :  { %v2871_v39 = vpop.f32.mrf.mxu1  ;;  %v2882_v40 = vpop.f32.mrf.mxu0 }
0x16c1   :  { %v1197_v41 = vpop.f32.mrf.mxu1  ;;  %v1274_v42 = vpop.f32.mrf.mxu0 }
0x16c2   :  { %v3722_v43 = vadd.f32 %v2595_v35, %v1197_v41  ;;  %v3724_v5 = vadd.f32 %v2595_v35, %v1274_v42 }
0x16c3   :  { %v2893_v44 = vpop.f32.mrf.mxu1  ;;  %v2904_v46 = vpop.f32.mrf.mxu0 }
0x16cb   :  { %v1351_v47 = vpop.f32.mrf.mxu1  ;;  %v1428_v48 = vpop.f32.mrf.mxu0 }
0x16cc   :  { %v3726_v50 = vadd.f32 %v2595_v35, %v1351_v47  ;;  %v3728_v51 = vadd.f32 %v2595_v35, %v1428_v48 }
0x16cd   :  { %v2915_v1 = vpop.f32.mrf.mxu1  ;;  %v2926_v52 = vpop.f32.mrf.mxu0 }
0x16d5   :  { %v1505_v2 = vpop.f32.mrf.mxu1  ;;  %v1582_v53 = vpop.f32.mrf.mxu0 }
0x16d6   :  { %v3730_v25 = vadd.f32 %v2595_v35, %v1505_v2  ;;  %v3732_v45 = vadd.f32 %v2595_v35, %v1582_v53 }
0x16d7   :  { %v2937_v7 = vpop.f32.mrf.mxu1  ;;  %v2948_v54 = vpop.f32.mrf.mxu0 }
0x16de   :  { %v1668_v55 = vpop.f32.mrf.mxu1 }
0x16df   :  { %v1669_v4 = vadd.f32 %v3737_v3, %v1668_v55 }
0x16e0   :  { %v2959_v28 = vpop.f32.mrf.mxu1 }
0x16e1   :  { %1680 = vrot.lane.b32.xlu1 %v1669_v4, %s3159_s30  ;;  %v1672_v49 = vadd.f32 %v1669_v4, %v1044_v57 }
0x16e3   :  { %v2613_v58 = vmul.f32 -1.442695, %v1672_v49 }
0x16e5   :  { %3101 = vpow2.f32 %v2613_v58 }
0x16f2   :  { %v3102_v59 = vpop.eup %3101 }
0x16f3   :  { %v1676_v60 = vadd.f32 1.0, %v3102_v59 }
0x16f5   :  { %3103 = vrcp.f32 %v1676_v60 }
0x1702   :  { %v3104_v61 = vpop.eup %3103 }
0x1703   :  { %v1690_v10 = vsub.f32 1.0, %v3104_v61  ;;  %v1696_v12 = vmul.f32 %v3104_v61, %v3533_v56 }
0x1753   :  { %v1681_v62 = vpop.permute.xlu1 %1680 }
0x1754   :  { %v1683_v63 = vmul.f32 %v3104_v61, %v1681_v62 }
0x1756   :  { %1685 = vrot.lane.b32.xlu0 %v1683_v63, %s3159_s30 }
0x17c8   :  { %v1686_v6 = vpop.permute.xlu0 %1685 }
0x17c9   :  { %v1688_v8 = vadd.f32 %v1686_v6, %v1044_v57 }
0x17cb   :  { %3105 = vtanh.f32 %v1688_v8 }
0x17d8   :  { %v3106_v9 = vpop.eup %3105 }
0x17d9   :  { %1692 = vrot.lane.b32.xlu1 %v3106_v9, %s3160_s3 }
0x184b   :  { %v1693_v11 = vpop.permute.xlu1 %1692 }
0x184c   :  { %v1695_v13 = vmul.f32 %v1693_v11, %v1690_v10 }
0x184e   :  { %v3744_v14 = vadd.f32 %v1696_v12, %v1695_v13 }
0x1850   :  { %1699 = vrot.lane.b32.xlu0 %v3744_v14, %s3160_s3 }
0x18c2   :  { %v1700_v15 = vpop.permute.xlu0 %1699 }
0x18c3   :  { %2969 = vmatmul.mubr.msk.f32.vlgmr.msra.gmra.mxu0 %vm51_vm1, %v1700_v15 }
0x18c4   :  { %2983 = vmatpush3.msra.mxu0 %v3665_v30  ;;  %2990 = vmatprep.mubr.msk.f32.mxu0 %vm3158_vm0, %v3157_v0 }
0x18c5   :  { %2984 = vmatprep.subr.mxu0 %v3157_v0 }
0x18c6   :  { %2985 = vmatpush3.msra.mxu0 %v3673_v31 }
0x18c7   :  { %2986 = vmatprep.subr.mxu0 %v3157_v0 }
0x18c8   :  { %2987 = vmatpush3.msra.mxu0 %v3683_v32 }
0x18c9   :  { %2988 = vmatprep.subr.mxu0 %v3157_v0 }
0x18ca   :  { %2989 = vmatpush3.msra.mxu0 %v3692_v33 }
0x18cb   :  { %3004 = vmatprep.subr.mxu0 %v3157_v0 }
0x1983   :  { %v1769_v56 = vpop.f32.mrf.mxu0 }
0x1984   :  { %v1770_v16 = vadd.f32 %v3737_v3, %v1769_v56 }
0x1985   :  { %v2970_v17 = vpop.f32.mrf.mxu0 }
0x1986   :  { %1781 = vrot.lane.b32.xlu1 %v1770_v16, %s3159_s30  ;;  %v1773_v18 = vadd.f32 %v1770_v16, %v3720_v38 }
0x1988   :  { %v2615_v19 = vmul.f32 -1.442695, %v1773_v18 }
0x198a   :  { %3107 = vpow2.f32 %v2615_v19 }
0x1997   :  { %v3108_v20 = vpop.eup %3107 }
0x1998   :  { %v1777_v21 = vadd.f32 1.0, %v3108_v20 }
0x199a   :  { %3109 = vrcp.f32 %v1777_v21 }
0x19a7   :  { %v3110_v22 = vpop.eup %3109 }
0x19a8   :  { %v1791_v34 = vsub.f32 1.0, %v3110_v22  ;;  %v1797_v36 = vmul.f32 %v3110_v22, %v3744_v14 }
0x19f8   :  { %v1782_v23 = vpop.permute.xlu1 %1781 }
0x19f9   :  { %v1784_v24 = vmul.f32 %v3110_v22, %v1782_v23 }
0x19fb   :  { %1786 = vrot.lane.b32.xlu0 %v1784_v24, %s3159_s30 }
0x1a6d   :  { %v1787_v26 = vpop.permute.xlu0 %1786 }
0x1a6e   :  { %v1789_v27 = vadd.f32 %v1787_v26, %v3720_v38 }
0x1a70   :  { %3111 = vtanh.f32 %v1789_v27 }
0x1a7d   :  { %v3112_v29 = vpop.eup %3111 }
0x1a7e   :  { %1793 = vrot.lane.b32.xlu1 %v3112_v29, %s3160_s3 }
0x1af0   :  { %v1794_v35 = vpop.permute.xlu1 %1793 }
0x1af1   :  { %v1796_v37 = vmul.f32 %v1794_v35, %v1791_v34 }
0x1af3   :  { %v3766_v39 = vadd.f32 %v1797_v36, %v1796_v37 }
0x1af5   :  { %1800 = vrot.lane.b32.xlu0 %v3766_v39, %s3160_s3 }
0x1b67   :  { %v1801_v40 = vpop.permute.xlu0 %1800 }
0x1b68   :  { %2980 = vmatmul.mubr.msk.f32.vlgmr.msra.gmra.mxu1 %vm51_vm1, %v1801_v40 }
0x1b69   :  { %2994 = vmatpush3.msra.mxu1 %v3665_v30  ;;  %3001 = vmatprep.mubr.msk.f32.mxu1 %vm3158_vm0, %v3157_v0 }
0x1b6a   :  { %2995 = vmatprep.subr.mxu1 %v3157_v0 }
0x1b6b   :  { %2996 = vmatpush3.msra.mxu1 %v3673_v31 }
0x1b6c   :  { %2997 = vmatprep.subr.mxu1 %v3157_v0 }
0x1b6d   :  { %2998 = vmatpush3.msra.mxu1 %v3683_v32 }
0x1b6e   :  { %2999 = vmatprep.subr.mxu1 %v3157_v0 }
0x1b6f   :  { %3000 = vmatpush3.msra.mxu1 %v3692_v33 }
0x1b70   :  { %3015 = vmatprep.subr.mxu1 %v3157_v0 }
0x1c28   :  { %v1870_v38 = vpop.f32.mrf.mxu1 }
0x1c29   :  { %v1871_v41 = vadd.f32 %v3737_v3, %v1870_v38 }
0x1c2a   :  { %v2981_v42 = vpop.f32.mrf.mxu1 }
0x1c2b   :  { %1882 = vrot.lane.b32.xlu1 %v1871_v41, %s3159_s30  ;;  %v1874_v44 = vadd.f32 %v1871_v41, %v3722_v43 }
0x1c2d   :  { %v2617_v46 = vmul.f32 -1.442695, %v1874_v44 }
0x1c2f   :  { %3113 = vpow2.f32 %v2617_v46 }
0x1c3c   :  { %v3114_v47 = vpop.eup %3113 }
0x1c3d   :  { %v1878_v48 = vadd.f32 1.0, %v3114_v47 }
0x1c3f   :  { %3115 = vrcp.f32 %v1878_v48 }
0x1c4c   :  { %v3116_v1 = vpop.eup %3115 }
0x1c4d   :  { %v1892_v55 = vsub.f32 1.0, %v3116_v1  ;;  %v1898_v28 = vmul.f32 %v3116_v1, %v3766_v39 }
0x1c9d   :  { %v1883_v52 = vpop.permute.xlu1 %1882 }
0x1c9e   :  { %v1885_v2 = vmul.f32 %v3116_v1, %v1883_v52 }
0x1ca0   :  { %1887 = vrot.lane.b32.xlu0 %v1885_v2, %s3159_s30 }
0x1d12   :  { %v1888_v53 = vpop.permute.xlu0 %1887 }
0x1d13   :  { %v1890_v7 = vadd.f32 %v1888_v53, %v3722_v43 }
0x1d15   :  { %3117 = vtanh.f32 %v1890_v7 }
0x1d22   :  { %v3118_v54 = vpop.eup %3117 }
0x1d23   :  { %1894 = vrot.lane.b32.xlu1 %v3118_v54, %s3160_s3 }
0x1d95   :  { %v1895_v4 = vpop.permute.xlu1 %1894 }
0x1d96   :  { %v1897_v57 = vmul.f32 %v1895_v4, %v1892_v55 }
0x1d98   :  { %v3788_v49 = vadd.f32 %v1898_v28, %v1897_v57 }
0x1d9a   :  { %1901 = vrot.lane.b32.xlu0 %v3788_v49, %s3160_s3 }
0x1e0c   :  { %v1902_v58 = vpop.permute.xlu0 %1901 }
0x1e0d   :  { %2991 = vmatmul.mubr.msk.f32.vlgmr.msra.gmra.mxu0 %vm51_vm1, %v1902_v58 }
0x1e0e   :  { %3005 = vmatpush3.msra.mxu0 %v3665_v30  ;;  %3012 = vmatprep.mubr.msk.f32.mxu0 %vm3158_vm0, %v3157_v0 }
0x1e0f   :  { %3006 = vmatprep.subr.mxu0 %v3157_v0 }
0x1e10   :  { %3007 = vmatpush3.msra.mxu0 %v3673_v31 }
0x1e11   :  { %3008 = vmatprep.subr.mxu0 %v3157_v0 }
0x1e12   :  { %3009 = vmatpush3.msra.mxu0 %v3683_v32 }
0x1e13   :  { %3010 = vmatprep.subr.mxu0 %v3157_v0 }
0x1e14   :  { %3011 = vmatpush3.msra.mxu0 %v3692_v33 }
0x1e15   :  { %3026 = vmatprep.subr.mxu0 %v3157_v0 }
0x1ecd   :  { %v1971_v43 = vpop.f32.mrf.mxu0 }
0x1ece   :  { %v1972_v59 = vadd.f32 %v3737_v3, %v1971_v43 }
0x1ecf   :  { %v2992_v60 = vpop.f32.mrf.mxu0 }
0x1ed0   :  { %1983 = vrot.lane.b32.xlu1 %v1972_v59, %s3159_s30  ;;  %v1975_v61 = vadd.f32 %v1972_v59, %v3724_v5 }
0x1ed2   :  { %v2619_v62 = vmul.f32 -1.442695, %v1975_v61 }
0x1ed4   :  { %3119 = vpow2.f32 %v2619_v62 }
0x1ee1   :  { %v3120_v63 = vpop.eup %3119 }
0x1ee2   :  { %v1979_v6 = vadd.f32 1.0, %v3120_v63 }
0x1ee4   :  { %3121 = vrcp.f32 %v1979_v6 }
0x1ef1   :  { %v3122_v8 = vpop.eup %3121 }
0x1ef2   :  { %v1993_v15 = vsub.f32 1.0, %v3122_v8  ;;  %v1999_v16 = vmul.f32 %v3122_v8, %v3788_v49 }
0x1f42   :  { %v1984_v9 = vpop.permute.xlu1 %1983 }
0x1f43   :  { %v1986_v10 = vmul.f32 %v3122_v8, %v1984_v9 }
0x1f45   :  { %1988 = vrot.lane.b32.xlu0 %v1986_v10, %s3159_s30 }
0x1fb7   :  { %v1989_v11 = vpop.permute.xlu0 %1988 }
0x1fb8   :  { %v1991_v12 = vadd.f32 %v1989_v11, %v3724_v5 }
0x1fba   :  { %3123 = vtanh.f32 %v1991_v12 }
0x1fc7   :  { %v3124_v13 = vpop.eup %3123 }
0x1fc8   :  { %1995 = vrot.lane.b32.xlu1 %v3124_v13, %s3160_s3 }
0x203a   :  { %v1996_v56 = vpop.permute.xlu1 %1995 }
0x203b   :  { %v1998_v17 = vmul.f32 %v1996_v56, %v1993_v15 }
0x203d   :  { %v3810_v18 = vadd.f32 %v1999_v16, %v1998_v17 }
0x203f   :  { %2002 = vrot.lane.b32.xlu0 %v3810_v18, %s3160_s3 }
0x20b1   :  { %v2003_v19 = vpop.permute.xlu0 %2002 }
0x20b2   :  { %3002 = vmatmul.mubr.msk.f32.vlgmr.msra.gmra.mxu1 %vm51_vm1, %v2003_v19 }
0x20b3   :  { %3016 = vmatpush3.msra.mxu1 %v3665_v30  ;;  %3023 = vmatprep.mubr.msk.f32.mxu1 %vm3158_vm0, %v3157_v0 }
0x20b4   :  { %3017 = vmatprep.subr.mxu1 %v3157_v0 }
0x20b5   :  { %3018 = vmatpush3.msra.mxu1 %v3673_v31 }
0x20b6   :  { %3019 = vmatprep.subr.mxu1 %v3157_v0 }
0x20b7   :  { %3020 = vmatpush3.msra.mxu1 %v3683_v32 }
0x20b8   :  { %3021 = vmatprep.subr.mxu1 %v3157_v0 }
0x20b9   :  { %3022 = vmatpush3.msra.mxu1 %v3692_v33 }
0x2172   :  { %v2072_v5 = vpop.f32.mrf.mxu1 }
0x2173   :  { %v2073_v20 = vadd.f32 %v3737_v3, %v2072_v5 }
0x2174   :  { %v3003_v21 = vpop.f32.mrf.mxu1 }
0x2175   :  { %2084 = vrot.lane.b32.xlu1 %v2073_v20, %s3159_s30  ;;  %v2076_v22 = vadd.f32 %v2073_v20, %v3726_v50 }
0x2177   :  { %v2621_v23 = vmul.f32 -1.442695, %v2076_v22 }
0x2179   :  { %3125 = vpow2.f32 %v2621_v23 }
0x2186   :  { %v3126_v24 = vpop.eup %3125 }
0x2187   :  { %v2080_v26 = vadd.f32 1.0, %v3126_v24 }
0x2189   :  { %3127 = vrcp.f32 %v2080_v26 }
0x2196   :  { %v3128_v27 = vpop.eup %3127 }
0x2197   :  { %v2094_v40 = vsub.f32 1.0, %v3128_v27  ;;  %v2100_v41 = vmul.f32 %v3128_v27, %v3810_v18 }
0x21e7   :  { %v2085_v29 = vpop.permute.xlu1 %2084 }
0x21e8   :  { %v2087_v34 = vmul.f32 %v3128_v27, %v2085_v29  ;;  %v2405_v27 = vrot.slane %v3766_v39, 6 }
0x21ea   :  { %2089 = vrot.lane.b32.xlu0 %v2087_v34, %s3159_s30  ;;  %v2407_v34 = vrot.slane %v3788_v49, 4 }
0x225c   :  { %v2090_v35 = vpop.permute.xlu0 %2089 }
0x225d   :  { %v2092_v36 = vadd.f32 %v2090_v35, %v3726_v50 }
0x225f   :  { %3129 = vtanh.f32 %v2092_v36  ;;  %v2419_v36 = vsel %vm2418_vm2, %v3744_v14, %v2405_v27  ;;  %v2429_v14 = vld [vmem:[%s3919_s9 + $0x10] sm:$0xff] }
0x226c   :  { %v3130_v37 = vpop.eup %3129 }
0x226d   :  { %2096 = vrot.lane.b32.xlu1 %v3130_v37, %s3160_s3  ;;  %v2421_v37 = vsel %vm2420_vm3, %v2419_v36, %v2407_v34 }
0x22df   :  { %v2097_v38 = vpop.permute.xlu1 %2096 }
0x22e0   :  { %v2099_v42 = vmul.f32 %v2097_v38, %v2094_v40 }
0x22e2   :  { %v3831_v44 = vadd.f32 %v2100_v41, %v2099_v42  ;;  %v2428_v41 = vld [vmem:[%s3919_s9 + $0x8] sm:$0xff]  ;;  %v2427_v42 = vld [vmem:[%s3919_s9] sm:$0xff] }
0x22e4   :  { %2103 = vrot.lane.b32.xlu0 %v3831_v44, %s3160_s3 }
0x2356   :  { %v2104_v46 = vpop.permute.xlu0 %2103 }
0x2357   :  { %3013 = vmatmul.mubr.msk.f32.vlgmr.msra.gmra.mxu0 %vm51_vm1, %v2104_v46 }
0x2358   :  { %3027 = vmatpush3.msra.mxu0 %v3665_v30  ;;  %3034 = vmatprep.mubr.msk.f32.mxu0 %vm3158_vm0, %v3157_v0 }
0x2359   :  { %3028 = vmatprep.subr.mxu0 %v3157_v0 }
0x235a   :  { %3029 = vmatpush3.msra.mxu0 %v3673_v31 }
0x235b   :  { %3030 = vmatprep.subr.mxu0 %v3157_v0 }
0x235c   :  { %3031 = vmatpush3.msra.mxu0 %v3683_v32 }
0x235d   :  { %3032 = vmatprep.subr.mxu0 %v3157_v0 }
0x235e   :  { %3033 = vmatpush3.msra.mxu0 %v3692_v33 }
0x2417   :  { %v2173_v50 = vpop.f32.mrf.mxu0 }
0x2418   :  { %v2174_v47 = vadd.f32 %v3737_v3, %v2173_v50 }
0x2419   :  { %v3014_v48 = vpop.f32.mrf.mxu0 }
0x241a   :  { %2185 = vrot.lane.b32.xlu1 %v2174_v47, %s3159_s30  ;;  %v2177_v30 = vadd.f32 %v2174_v47, %v3728_v51 }
0x241c   :  { %v2623_v1 = vmul.f32 -1.442695, %v2177_v30 }
0x241e   :  { %3131 = vpow2.f32 %v2623_v1 }
0x242b   :  { %v3132_v52 = vpop.eup %3131 }
0x242c   :  { %v2181_v31 = vadd.f32 1.0, %v3132_v52 }
0x242e   :  { %3133 = vrcp.f32 %v2181_v31 }
0x243b   :  { %v3134_v2 = vpop.eup %3133 }
0x243c   :  { %v2195_v54 = vsub.f32 1.0, %v3134_v2  ;;  %v2201_v4 = vmul.f32 %v3134_v2, %v3831_v44 }
0x248c   :  { %v2186_v53 = vpop.permute.xlu1 %2185 }
0x248d   :  { %v2188_v32 = vmul.f32 %v3134_v2, %v2186_v53 }
0x248f   :  { %2190 = vrot.lane.b32.xlu0 %v2188_v32, %s3159_s30 }
0x2501   :  { %v2191_v0 = vpop.permute.xlu0 %2190 }
0x2502   :  { %v2193_v33 = vadd.f32 %v2191_v0, %v3728_v51 }
0x2504   :  { %3135 = vtanh.f32 %v2193_v33  ;;  %v2628_v33 = vld [vmem:[%s3920_s10] ss:$0 sm:$0xff] }
0x2511   :  { %v3136_v7 = vpop.eup %3135 }
0x2512   :  { %2197 = vrot.lane.b32.xlu1 %v3136_v7, %s3160_s3 }
0x2584   :  { %v2198_v55 = vpop.permute.xlu1 %2197 }
0x2585   :  { %v2200_v28 = vmul.f32 %v2198_v55, %v2195_v54 }
0x2587   :  { %v3852_v57 = vadd.f32 %v2201_v4, %v2200_v28 }
0x2589   :  { %2204 = vrot.lane.b32.xlu0 %v3852_v57, %s3160_s3  ;;  %v2411_v47 = vrot.slane %v3852_v57, 6 }
0x258b   :  { %v2424_v2 = vsel %vm2418_vm2, %v3831_v44, %v2411_v47 }
0x25fb   :  { %v2205_v58 = vpop.permute.xlu0 %2204 }
0x25fc   :  { %3024 = vmatmul.mubr.msk.f32.vlgmr.msra.gmra.mxu1 %vm51_vm1, %v2205_v58 }
0x26bc   :  { %v2274_v43 = vpop.f32.mrf.mxu1 }
0x26bd   :  { %v2275_v51 = vadd.f32 %v3737_v3, %v2274_v43 }
0x26be   :  { %v3025_v59 = vpop.f32.mrf.mxu1 }
0x26bf   :  { %2286 = vrot.lane.b32.xlu1 %v2275_v51, %s3159_s30  ;;  %v2278_v60 = vadd.f32 %v2275_v51, %v3730_v25 }
0x26c1   :  { %v2625_v61 = vmul.f32 -1.442695, %v2278_v60 }
0x26c3   :  { %3137 = vpow2.f32 %v2625_v61 }
0x26d0   :  { %v3138_v62 = vpop.eup %3137 }
0x26d1   :  { %v2282_v63 = vadd.f32 1.0, %v3138_v62 }
0x26d3   :  { %3139 = vrcp.f32 %v2282_v63 }
0x26e0   :  { %v3140_v6 = vpop.eup %3139 }
0x26e1   :  { %v2296_v13 = vsub.f32 1.0, %v3140_v6  ;;  %v2302_v56 = vmul.f32 %v3140_v6, %v3852_v57 }
0x2731   :  { %v2287_v8 = vpop.permute.xlu1 %2286 }
0x2732   :  { %v2289_v9 = vmul.f32 %v3140_v6, %v2287_v8 }
0x2734   :  { %2291 = vrot.lane.b32.xlu0 %v2289_v9, %s3159_s30 }
0x27a6   :  { %v2292_v10 = vpop.permute.xlu0 %2291 }
0x27a7   :  { %v2294_v11 = vadd.f32 %v2292_v10, %v3730_v25 }
0x27a9   :  { %3141 = vtanh.f32 %v2294_v11 }
0x27b6   :  { %v3142_v12 = vpop.eup %3141 }
0x27b7   :  { %2298 = vrot.lane.b32.xlu1 %v3142_v12, %s3160_s3 }
0x2829   :  { %v2299_v15 = vpop.permute.xlu1 %2298 }
0x282a   :  { %v2301_v16 = vmul.f32 %v2299_v15, %v2296_v13 }
0x282c   :  { %v2303_v17 = vadd.f32 %v2302_v56, %v2301_v16 }
0x282e   :  { %2305 = vrot.lane.b32.xlu0 %v2303_v17, %s3160_s3  ;;  %v2413_v1 = vrot.slane %v2303_v17, 4 }
0x2830   :  { %v2425_v53 = vsel %vm2420_vm3, %v2424_v2, %v2413_v1 }
0x28a0   :  { %v2306_v19 = vpop.permute.xlu0 %2305 }
0x28a1   :  { %3035 = vmatmul.mubr.msk.f32.vlgmr.msra.gmra.mxu0 %vm51_vm1, %v2306_v19 }
0x2961   :  { %v2375_v5 = vpop.f32.mrf.mxu0 }
0x2962   :  { %v2376_v20 = vadd.f32 %v3737_v3, %v2375_v5  ;;  %v2409_v3 = vrot.slane %v3810_v18, 2  ;;  %v2430_v18 = vld [vmem:[%s3919_s9 + $0x18] sm:$0xff] }
0x2963   :  { %v3036_v21 = vpop.f32.mrf.mxu0  ;;  %3037 = vmatprep.subr.mxu1 %v2430_v18 }
0x2964   :  { %2387 = vrot.lane.b32.xlu1 %v2376_v20, %s3159_s30  ;;  %v2379_v25 = vadd.f32 %v2376_v20, %v3732_v45  ;;  %v2423_v40 = vsel %vm2422_vm4, %v2421_v37, %v2409_v3  ;;  %3038 = vmatpush3.msra.mxu1 %v2430_v18 }
0x2965   :  { %3039 = vmatprep.subr.mxu1 %v2429_v14 }
0x2966   :  { %v2627_v22 = vmul.f32 -1.442695, %v2379_v25  ;;  %3040 = vmatpush3.msra.mxu1 %v2429_v14 }
0x2967   :  { %3041 = vmatprep.subr.mxu1 %v2428_v41 }
0x2968   :  { %3143 = vpow2.f32 %v2627_v22  ;;  %3042 = vmatpush3.msra.mxu1 %v2428_v41 }
0x2969   :  { %3043 = vmatprep.subr.mxu1 %v2427_v42 }
0x296a   :  { %3044 = vmatpush3.msra.mxu1 %v2427_v42 }
0x2975   :  { %v3144_v23 = vpop.eup %3143 }
0x2976   :  { %v2383_v24 = vadd.f32 1.0, %v3144_v23 }
0x2978   :  { %3145 = vrcp.f32 %v2383_v24 }
0x2985   :  { %v3146_v26 = vpop.eup %3145 }
0x2986   :  { %v2397_v46 = vsub.f32 1.0, %v3146_v26  ;;  %v2403_v48 = vmul.f32 %v3146_v26, %v2303_v17 }
0x29d6   :  { %v2388_v29 = vpop.permute.xlu1 %2387 }
0x29d7   :  { %v2390_v35 = vmul.f32 %v3146_v26, %v2388_v29 }
0x29d9   :  { %2392 = vrot.lane.b32.xlu0 %v2390_v35, %s3159_s30 }
0x29dd   :  { %2440 = vrot.lane.b32.xlu0 %v2423_v40, %s3160_s3 }
0x2a4b   :  { %v2393_v39 = vpop.permute.xlu0 %2392 }
0x2a4c   :  { %v2395_v49 = vadd.f32 %v2393_v39, %v3732_v45 }
0x2a4e   :  { %3147 = vtanh.f32 %v2395_v49 }
0x2a4f   :  { %v2441_v38 = vpop.permute.xlu0 %2440 }
0x2a50   :  { %3045 = vmatprep.mubr.msk.f32.mxu1 %vm51_vm1, %v2441_v38 }
0x2a5b   :  { %v3148_v45 = vpop.eup %3147 }
0x2a5c   :  { %2399 = vrot.lane.b32.xlu1 %v3148_v45, %s3160_s3 }
0x2ace   :  { %v2400_v50 = vpop.permute.xlu1 %2399 }
0x2acf   :  { %v2402_v30 = vmul.f32 %v2400_v50, %v2397_v46 }
0x2ad1   :  { %v2404_v52 = vadd.f32 %v2403_v48, %v2402_v30 }
0x2ad3   :  { %v2416_v31 = vrot.slane %v2404_v52, 2 }
0x2ad5   :  { %v2426_v32 = vsel %vm2422_vm4, %v2425_v53, %v2416_v31 }
0x2ad6   :  { %2442 = vrot.lane.b32.xlu1 %v2426_v32, %s3160_s3 }
0x2b48   :  { %v2443_v0 = vpop.permute.xlu1 %2442 }
0x2b49   :  { %3046 = vmatmul.mubr.msk.f32.vlgmr.msra.gmra.mxu1 %vm51_vm1, %v2443_v0 }
0x2c09   :  { %v3047_v7 = vpop.f32.mrf.mxu1 }
0x2c0a   :  { %v2520_v54 = vadd.f32 %v3047_v7, %v2628_v33 }
0x2c0b   :  { %v2514_v55 = vpop.f32.mrf.mxu1 }
0x2c0c   :  { %v2515_v4 = vadd.f32 %v2628_v33, %v2514_v55  ;;  %2525 = vmax.xlane.f32.xlu1 %v2520_v54 }
0x2c0e   :  { %2523 = vmax.xlane.f32.xlu0 %v2515_v4 }
0x2c95   :  { %v2526_v44 = vpop.xlane.xlu1 %2525 }
0x2c96   :  { %v2528_v57 = vsub.f32 %v2520_v54, %v2526_v44 }
0x2c97   :  { %v2524_v28 = vpop.xlane.xlu0 %2523 }
0x2c98   :  { %v2527_v58 = vsub.f32 %v2515_v4, %v2524_v28  ;;  %v2531_v51 = vmul.f32 1.442695, %v2528_v57 }
0x2c9a   :  { %v2529_v43 = vmul.f32 1.442695, %v2527_v58 }
0x2c9c   :  { %3149 = vpow2.f32 %v2529_v43 }
0x2c9d   :  { %3151 = vpow2.f32 %v2531_v51 }
0x2ca9   :  { %v3150_v59 = vpop.eup %3149 }
0x2caa   :  { %2533 = vadd.xlane.f32.xlu0 %v3150_v59  ;;  %v3152_v60 = vpop.eup %3151 }
0x2cae   :  { %2535 = vadd.xlane.f32.xlu0 %v3152_v60 }
0x2d33   :  { %v2534_v61 = vpop.xlane.xlu0 %2533 }
0x2d34   :  { %3153 = vlog2.f32 %v2534_v61 }
0x2d37   :  { %v2536_v62 = vpop.xlane.xlu0 %2535 }
0x2d38   :  { %3155 = vlog2.f32 %v2536_v62 }
0x2d41   :  { %v3154_v63 = vpop.eup %3153 }
0x2d42   :  { %v2538_v6 = vmul.f32 0.6931472, %v3154_v63 }
0x2d44   :  { %v2541_v8 = vadd.f32 %v2538_v6, %v2524_v28 }
0x2d45   :  { %v3156_v9 = vpop.eup %3155 }
0x2d46   :  { %v2543_v10 = vsub.f32 %v2515_v4, %v2541_v8  ;;  %v2540_v11 = vmul.f32 0.6931472, %v3156_v9 }
0x2d48   :  { %2545 = vst [vmem:[%s3921_s11] sm:$0xff] %v2543_v10  ;;  %v2542_v12 = vadd.f32 %v2540_v11, %v2526_v44 }
0x2d4a   :  { %v2544_v13 = vsub.f32 %v2520_v54, %v2542_v12 }
0x2d4c   :  { %2546 = vst [vmem:[%s3921_s11 + $0x8] sm:$0xff] %v2544_v13 }

</bundles_post_ra>
